<compile_context>
chip_gen: v5e
topology: v5e:2x2
jax: 0.10.0
libtpu: 0.0.40
codegen_flags: <defaults>
</compile_context>

<pallas_src>
import functools
import math

import jax
import jax.numpy as jnp
from jax import lax
from jax.experimental import pallas as pl
from jax.experimental.pallas import tpu as pltpu


# ------------------------------ helpers ------------------------------------ #

def _row_block(m, target=1024):
    """Row-tile size: whole array if small, else a multiple-of-8 tile <= target.

    Sized so a (block, d_model) f32 tile stays in the low-MB range, safe for the
    32 MiB default scoped VMEM on v7x with double buffering.
    """
    if m <= target:
        return m
    return (target // 8) * 8


# --------------------------- projection kernel ----------------------------- #

def _proj_kernel(x_ref, g_ref, b_ref, w_ref, o_ref, *, pre_ln, eps):
    x = x_ref[...]                                       # (bm, K) f32
    if pre_ln:
        mean = jnp.mean(x, axis=-1, keepdims=True)
        var = jnp.mean((x - mean) ** 2, axis=-1, keepdims=True)
        x = (x - mean) * lax.rsqrt(var + eps) * g_ref[...] + b_ref[...]
    # bf16 MXU operands, f32 accumulation.
    o_ref[...] = jnp.dot(x.astype(jnp.bfloat16), w_ref[...],
                         preferred_element_type=jnp.float32).astype(o_ref.dtype)


def linear_proj(x2d, w, *, ln_gamma=None, ln_beta=None, eps=1e-6,
                out_dtype=jnp.bfloat16):
    """y = [LN](x2d) @ w  (no bias).  x2d: (M,K) f32, w: (K,N) f32 -> (M,N) out_dtype."""
    M, K = x2d.shape
    N = w.shape[1]
    pre_ln = ln_gamma is not None
    if not pre_ln:
        ln_gamma = jnp.ones((K,), jnp.float32)
        ln_beta = jnp.zeros((K,), jnp.float32)

    bm = _row_block(M)
    grid = (pl.cdiv(M, bm),)
    kernel = functools.partial(_proj_kernel, pre_ln=pre_ln, eps=eps)
    cost = pl.CostEstimate(
        flops=2 * M * K * N + (6 * M * K if pre_ln else 0),
        transcendentals=M if pre_ln else 0,
        bytes_accessed=4 * M * K + 2 * K * N + 2 * M * N + 8 * K,
    )
    return pl.pallas_call(
        kernel,
        out_shape=jax.ShapeDtypeStruct((M, N), out_dtype),
        grid=grid,
        in_specs=[
            pl.BlockSpec((bm, K), lambda i: (i, 0)),
            pl.BlockSpec((1, K), lambda i: (0, 0)),
            pl.BlockSpec((1, K), lambda i: (0, 0)),
            pl.BlockSpec((K, N), lambda i: (0, 0)),       # weight resident
        ],
        out_specs=pl.BlockSpec((bm, N), lambda i: (i, 0)),
        compiler_params=pltpu.CompilerParams(dimension_semantics=("parallel",)),
        cost_estimate=cost,
    )(x2d, ln_gamma.reshape(1, K), ln_beta.reshape(1, K),
      w.astype(jnp.bfloat16))


# ----------------------------- attention kernel ----------------------------- #

def _attn_kernel(q_ref, k_ref, v_ref, o_ref, attn_ref, *, scale):
    q = q_ref[0]                                         # (bq, dk) bf16
    k = k_ref[0]                                         # (Lk, dk) bf16
    v = v_ref[0]                                         # (Lk, dv) bf16
    # scores = (q @ k^T) * scale, computed with contracted rhs dim (no transpose op)
    s = lax.dot_general(q, k, (((1,), (1,)), ((), ())),
                        preferred_element_type=jnp.float32) * scale   # (bq, Lk) f32
    s_max = jnp.max(s, axis=-1, keepdims=True)
    p = jnp.exp(s - s_max)                               # EUP
    denom = jnp.sum(p, axis=-1, keepdims=True)
    attn = p * pl.reciprocal(denom, approx=True)         # EUP reciprocal
    attn_ref[0] = attn
    o_ref[0] = jnp.dot(attn.astype(jnp.bfloat16), v,
                       preferred_element_type=jnp.float32).astype(o_ref.dtype)


def attention(qh, kh, vh, *, scale, block_q=256):
    """qh: (BH, Lq, dk) bf16, kh: (BH, Lk, dk) bf16, vh: (BH, Lk, dv) bf16."""
    BH, Lq, dk = qh.shape
    Lk = kh.shape[1]
    dv = vh.shape[2]
    bq = min(Lq, block_q)
    grid = (BH, pl.cdiv(Lq, bq))
    kernel = functools.partial(_attn_kernel, scale=scale)
    cost = pl.CostEstimate(
        flops=2 * BH * Lq * Lk * (dk + dv) + 5 * BH * Lq * Lk,
        transcendentals=BH * Lq * Lk + BH * Lq,
        bytes_accessed=2 * BH * (Lq * dk + Lk * dk + Lk * dv + Lq * dv)
                       + 4 * BH * Lq * Lk,
    )
    return pl.pallas_call(
        kernel,
        out_shape=(jax.ShapeDtypeStruct((BH, Lq, dv), jnp.bfloat16),
                   jax.ShapeDtypeStruct((BH, Lq, Lk), jnp.float32)),
        grid=grid,
        in_specs=[
            pl.BlockSpec((1, bq, dk), lambda h, i: (h, i, 0)),
            pl.BlockSpec((1, Lk, dk), lambda h, i: (h, 0, 0)),   # K resident per head
            pl.BlockSpec((1, Lk, dv), lambda h, i: (h, 0, 0)),   # V resident per head
        ],
        out_specs=(pl.BlockSpec((1, bq, dv), lambda h, i: (h, i, 0)),
                   pl.BlockSpec((1, bq, Lk), lambda h, i: (h, i, 0))),
        compiler_params=pltpu.CompilerParams(
            dimension_semantics=("parallel", "parallel")),
        cost_estimate=cost,
    )(qh, kh, vh)


# ------------------------ fc + residual (+ post-LN) ------------------------- #

def _fc_residual_kernel(x_ref, w_ref, b_ref, res_ref, g_ref, beta_ref, o_ref, *,
                        post_ln, eps):
    y = jnp.dot(x_ref[...], w_ref[...], preferred_element_type=jnp.float32)
    y = y + b_ref[...] + res_ref[...]                    # bias + residual, f32
    if post_ln:
        mean = jnp.mean(y, axis=-1, keepdims=True)
        var = jnp.mean((y - mean) ** 2, axis=-1, keepdims=True)
        y = (y - mean) * lax.rsqrt(var + eps) * g_ref[...] + beta_ref[...]
    o_ref[...] = y.astype(o_ref.dtype)


def fc_residual(x2d, w, b, res2d, gamma, beta, *, post_ln, eps=1e-6):
    """y = [LN]( x2d @ w + b + res2d ).  x2d: (M,K) bf16, w: (K,N), res2d: (M,N) f32."""
    M, K = x2d.shape
    N = w.shape[1]
    bm = _row_block(M)
    grid = (pl.cdiv(M, bm),)
    kernel = functools.partial(_fc_residual_kernel, post_ln=post_ln, eps=eps)
    cost = pl.CostEstimate(
        flops=2 * M * K * N + 2 * M * N + (6 * M * N if post_ln else 0),
        transcendentals=M if post_ln else 0,
        bytes_accessed=2 * M * K + 2 * K * N + 4 * N + 4 * M * N + 4 * M * N + 8 * N,
    )
    return pl.pallas_call(
        kernel,
        out_shape=jax.ShapeDtypeStruct((M, N), jnp.float32),
        grid=grid,
        in_specs=[
            pl.BlockSpec((bm, K), lambda i: (i, 0)),
            pl.BlockSpec((K, N), lambda i: (0, 0)),       # weight resident
            pl.BlockSpec((1, N), lambda i: (0, 0)),
            pl.BlockSpec((bm, N), lambda i: (i, 0)),
            pl.BlockSpec((1, N), lambda i: (0, 0)),
            pl.BlockSpec((1, N), lambda i: (0, 0)),
        ],
        out_specs=pl.BlockSpec((bm, N), lambda i: (i, 0)),
        compiler_params=pltpu.CompilerParams(dimension_semantics=("parallel",)),
        cost_estimate=cost,
    )(x2d, w.astype(jnp.bfloat16), b.reshape(1, N), res2d,
      gamma.reshape(1, N), beta.reshape(1, N))


# ----------------------------- module forward ------------------------------- #

def init_params(key, d_model, n_head, d_k, d_v):
    ks = jax.random.split(key, 4)

    def xavier_uniform(k, fan_in, fan_out):
        bound = math.sqrt(6.0 / (fan_in + fan_out))
        return jax.random.uniform(k, (fan_in, fan_out), jnp.float32, -bound, bound)

    return {
        "w_qs": xavier_uniform(ks[0], d_model, n_head * d_k),
        "w_ks": xavier_uniform(ks[1], d_model, n_head * d_k),
        "w_vs": xavier_uniform(ks[2], d_model, n_head * d_v),
        "w_fc": xavier_uniform(ks[3], n_head * d_v, d_model),
        "b_fc": jnp.zeros((d_model,), jnp.float32),
        "ln_g": jnp.ones((d_model,), jnp.float32),
        "ln_b": jnp.zeros((d_model,), jnp.float32),
    }


def multi_head_attention(q, k, v, params, *, n_head, d_k, d_v,
                         normalize_before=True, mask=None):
    """Returns (output (B,Lq,d_model) f32, attn (B,H,Lq,Lk) f32).  Eval-mode dropout."""
    assert mask is None  # TODO(synk): attention mask path not implemented.
    B, Lq, d_model = q.shape
    Lk = k.shape[1]
    Lv = v.shape[1]
    residual = q

    q2d = q.reshape(B * Lq, d_model)
    k2d = k.reshape(B * Lk, d_model)
    v2d = v.reshape(B * Lv, d_model)

    # Q projection, with pre-LayerNorm fused when normalize_before.
    if normalize_before:
        qp = linear_proj(q2d, params["w_qs"], ln_gamma=params["ln_g"],
                         ln_beta=params["ln_b"], eps=1e-6)
    else:
        qp = linear_proj(q2d, params["w_qs"])
    kp = linear_proj(k2d, params["w_ks"])
    vp = linear_proj(v2d, params["w_vs"])

    # (B*L, H*dh) -> (B*H, L, dh)   (glue reshapes/transposes stay in XLA)
    def to_heads(x2d, L, dh):
        return (x2d.reshape(B, L, n_head, dh)
                   .transpose(0, 2, 1, 3)
                   .reshape(B * n_head, L, dh))

    qh = to_heads(qp, Lq, d_k)
    kh = to_heads(kp, Lk, d_k)
    vh = to_heads(vp, Lv, d_v)

    out_h, attn = attention(qh, kh, vh, scale=1.0 / math.sqrt(d_k))

    # (B*H, Lq, dv) -> (B*Lq, H*dv)
    out2d = (out_h.reshape(B, n_head, Lq, d_v)
                  .transpose(0, 2, 1, 3)
                  .reshape(B * Lq, n_head * d_v))

    out = fc_residual(out2d, params["w_fc"], params["b_fc"],
                      residual.reshape(B * Lq, d_model),
                      params["ln_g"], params["ln_b"],
                      post_ln=not normalize_before, eps=1e-6)

    return out.reshape(B, Lq, d_model), attn.reshape(B, n_head, Lq, Lk)


# ---------------------------------- main ------------------------------------ #

if __name__ == "__main__":
    B, L, d_model, n_head, d_k, d_v = 2, 128, 128, 4, 32, 32

    key = jax.random.PRNGKey(0)
    kq, kk, kv, kparam = jax.random.split(key, 4)
    q = jax.random.normal(kq, (B, L, d_model), jnp.float32)
    k = jax.random.normal(kk, (B, L, d_model), jnp.float32)
    v = jax.random.normal(kv, (B, L, d_model), jnp.float32)
    params = init_params(kparam, d_model, n_head, d_k, d_v)

    out, attn = multi_head_attention(q, k, v, params, n_head=n_head,
                                     d_k=d_k, d_v=d_v, normalize_before=True)
    out, attn = jax.block_until_ready((out, attn))

    assert out.shape == (B, L, d_model), out.shape
    assert attn.shape == (B, n_head, L, L), attn.shape
    assert bool(jnp.all(jnp.isfinite(out)))
    assert bool(jnp.all(jnp.isfinite(attn)))
    # softmax rows must sum to ~1 (approx reciprocal -> loose tolerance)
    row_sums = jnp.sum(attn, axis=-1)
    assert bool(jnp.all(jnp.abs(row_sums - 1.0) < 1e-2)), float(
        jnp.max(jnp.abs(row_sums - 1.0)))
    print("KERNEL_OK")
</pallas_src>

<mosaic_0001>
module attributes {stable_mosaic.version = 11 : i64} {
  func.func @_proj_kernel(%arg0: i32, %arg1: memref<256x128xf32, #tpu.memory_space<vmem>>, %arg2: memref<1x128xf32, #tpu.memory_space<vmem>>, %arg3: memref<1x128xf32, #tpu.memory_space<vmem>>, %arg4: memref<128x128xbf16, #tpu.memory_space<vmem>>, %arg5: memref<256x128xbf16, #tpu.memory_space<vmem>>) attributes {dimension_semantics = [#tpu.dimension_semantics<parallel>], iteration_bounds = array<i64: 1>, scalar_prefetch = 0 : i64, scratch_operands = 0 : i64, tpu.core_type = #tpu.core_type<tc>, window_params = [{transform_indices = @transform_0, window_bounds = array<i64: 256, 128>}, {pipeline_mode = #tpu.pipeline_mode<synchronous>, transform_indices = @transform_1, window_bounds = array<i64: 1, 128>}, {pipeline_mode = #tpu.pipeline_mode<synchronous>, transform_indices = @transform_2, window_bounds = array<i64: 1, 128>}, {pipeline_mode = #tpu.pipeline_mode<synchronous>, transform_indices = @transform_3, window_bounds = array<i64: 128, 128>}, {transform_indices = @transform_4, window_bounds = array<i64: 256, 128>}]} {
    %c0 = arith.constant 0 : index
    %c0_0 = arith.constant 0 : index
    %0 = vector.load %arg1[%c0, %c0_0] : memref<256x128xf32, #tpu.memory_space<vmem>>, vector<256x128xf32>
    %cst = arith.constant dense<0.000000e+00> : vector<256xf32>
    %1 = vector.multi_reduction <add>, %0, %cst [1] : vector<256x128xf32> to vector<256xf32>
    %2 = vector.shape_cast %1 : vector<256xf32> to vector<256x1xf32>
    %cst_1 = arith.constant 1.280000e+02 : f32
    %3 = vector.broadcast %cst_1 : f32 to vector<256x1xf32>
    %4 = arith.divf %2, %3 : vector<256x1xf32>
    %5 = vector.broadcast %4 : vector<256x1xf32> to vector<256x128xf32>
    %6 = arith.subf %0, %5 : vector<256x128xf32>
    %7 = arith.mulf %6, %6 : vector<256x128xf32>
    %cst_2 = arith.constant dense<0.000000e+00> : vector<256xf32>
    %8 = vector.multi_reduction <add>, %7, %cst_2 [1] : vector<256x128xf32> to vector<256xf32>
    %9 = vector.shape_cast %8 : vector<256xf32> to vector<256x1xf32>
    %cst_3 = arith.constant 1.280000e+02 : f32
    %10 = vector.broadcast %cst_3 : f32 to vector<256x1xf32>
    %11 = arith.divf %9, %10 : vector<256x1xf32>
    %12 = vector.broadcast %4 : vector<256x1xf32> to vector<256x128xf32>
    %13 = arith.subf %0, %12 : vector<256x128xf32>
    %cst_4 = arith.constant 9.99999997E-7 : f32
    %14 = vector.broadcast %cst_4 : f32 to vector<256x1xf32>
    %15 = arith.addf %11, %14 : vector<256x1xf32>
    %16 = math.rsqrt %15 : vector<256x1xf32>
    %17 = vector.broadcast %16 : vector<256x1xf32> to vector<256x128xf32>
    %18 = arith.mulf %13, %17 : vector<256x128xf32>
    %c0_5 = arith.constant 0 : index
    %c0_6 = arith.constant 0 : index
    %19 = vector.load %arg2[%c0_5, %c0_6] : memref<1x128xf32, #tpu.memory_space<vmem>>, vector<1x128xf32>
    %20 = vector.broadcast %19 : vector<1x128xf32> to vector<256x128xf32>
    %21 = arith.mulf %18, %20 : vector<256x128xf32>
    %c0_7 = arith.constant 0 : index
    %c0_8 = arith.constant 0 : index
    %22 = vector.load %arg3[%c0_7, %c0_8] : memref<1x128xf32, #tpu.memory_space<vmem>>, vector<1x128xf32>
    %23 = vector.broadcast %22 : vector<1x128xf32> to vector<256x128xf32>
    %24 = arith.addf %21, %23 : vector<256x128xf32>
    %25 = arith.truncf %24 : vector<256x128xf32> to vector<256x128xbf16>
    %c0_9 = arith.constant 0 : index
    %c0_10 = arith.constant 0 : index
    %26 = vector.load %arg4[%c0_9, %c0_10] : memref<128x128xbf16, #tpu.memory_space<vmem>>, vector<128x128xbf16>
    %cst_11 = arith.constant dense<0.000000e+00> : vector<256x128xf32>
    %27 = tpu.matmul %25, %26, %cst_11 {dimension_numbers = #tpu.dot_dimension_numbers<[1], [0], [0], [1], [0, 0, 1, 1], [], []>} : vector<256x128xbf16>, vector<128x128xbf16>, vector<256x128xf32> -> vector<256x128xf32>
    %28 = arith.truncf %27 : vector<256x128xf32> to vector<256x128xbf16>
    %c0_12 = arith.constant 0 : index
    %c0_13 = arith.constant 0 : index
    %29 = vector.load %arg5[%c0_12, %c0_13] : memref<256x128xbf16, #tpu.memory_space<vmem>>, vector<256x128xbf16>
    tpu.vector_store %arg5[%c0_12, %c0_13], %28 {strides = array<i32>} : memref<256x128xbf16, #tpu.memory_space<vmem>>, vector<256x128xbf16>,
    return
  }
  func.func @transform_0(%arg0: i32) -> (i32, i32) {
    %c0_i32 = arith.constant 0 : i32
    %c0_i32_0 = arith.constant 0 : i32
    return %arg0, %c0_i32 : i32, i32
  }
  func.func @transform_1(%arg0: i32) -> (i32, i32) {
    %c0_i32 = arith.constant 0 : i32
    %c0_i32_0 = arith.constant 0 : i32
    %c0_i32_1 = arith.constant 0 : i32
    return %c0_i32, %c0_i32_0 : i32, i32
  }
  func.func @transform_2(%arg0: i32) -> (i32, i32) {
    %c0_i32 = arith.constant 0 : i32
    %c0_i32_0 = arith.constant 0 : i32
    %c0_i32_1 = arith.constant 0 : i32
    return %c0_i32, %c0_i32_0 : i32, i32
  }
  func.func @transform_3(%arg0: i32) -> (i32, i32) {
    %c0_i32 = arith.constant 0 : i32
    %c0_i32_0 = arith.constant 0 : i32
    %c0_i32_1 = arith.constant 0 : i32
    return %c0_i32, %c0_i32_0 : i32, i32
  }
  func.func @transform_4(%arg0: i32) -> (i32, i32) {
    %c0_i32 = arith.constant 0 : i32
    %c0_i32_0 = arith.constant 0 : i32
    return %arg0, %c0_i32 : i32, i32
  }
}

</mosaic_0001>

<bundles_post_ra>
// kernel: tpu_custom_call.1
= control target key start
LH: loop header
LB: loop body
LE: loop exit
PB: predicated region body
PF: predicated region fallthrough
CT: control target
= control target key end

     0   :  { %9 = vsyncpa [#allocation3], 0  ;;  %s2530_s0 = inlined_call_operand.hbm [shape: f32[256,128], index: 0, kind: input, shape index: {}]   ;;  %s2531_s1 = inlined_call_operand.hbm [shape: f32[1,128], index: 1, kind: input, shape index: {}]   ;;  %s2532_s2 = inlined_call_operand.vmem [shape: f32[1,128], index: 2, kind: input, shape index: {}]   ;;  %s2533_s3 = inlined_call_operand.hbm [shape: bf16[128,128], index: 3, kind: input, shape index: {}]   ;;  %s2534_s4 = inlined_call_operand.hbm [shape: bf16[256,128], index: 4, kind: output, shape index: {}]  }
   0x1   :  { %10 = vsyncpa [#allocation6], 0  ;;  %s30_s17 = sshll.u32 %s2531_s1, 4  ;;  %s31_s17 = int_to_ptr.hbm [resolvable:$true] %s30_s17 }
   0x2   :  { %11 = vsyncpa [#allocation4], 0  ;;  %s1405_s18 = smov [#allocation5]   ;;  %s16_s22 = sshll.u32 %s2530_s0, 4  ;;  %s17_s22 = int_to_ptr.hbm [resolvable:$true] %s16_s22 }
   0x3   :  { %s32_s19 = sshll.u32 %s1405_s18, 4  ;;  %s1406_s23 = smov [#allocation2]   ;;  %s33_s19 = int_to_ptr.vmem [resolvable:$true] %s32_s19 }
   0x4   :  { %35 = dma.hbm_to_vmem [thread:$0]  %s31_s17, 16, %s33_s19, [#allocation6]  }
   0x5   :  { %s18_s24 = sshll.u32 %s1406_s23, 4  ;;  %s1407_s25 = smov 128   ;;  %s19_s24 = int_to_ptr.vmem [resolvable:$true] %s18_s24 }
   0x6   :  { %s1408_s26 = smov 8   ;;  %s42_s1 = sshll.u32 %s2533_s3, 4  ;;  %s43_s1 = int_to_ptr.hbm [resolvable:$true] %s42_s1 }
   0x7   :  { %24 = dma.hbm_to_vmem [thread:$0]  %s17_s22, 4096, %s19_s24, [#allocation3], %s1407_s25, %s1407_s25, %s1408_s26  }
   0x8   :  { %s1409_s29 = smov [#allocation7]   ;;  %s1410_s5 = smov 64  }
   0x9   :  { %s44_s30 = sshll.u32 %s1409_s29, 4  ;;  %s1411_s6 = smov 4   ;;  %s45_s30 = int_to_ptr.vmem [resolvable:$true] %s44_s30 }
   0xa   :  { %50 = dma.hbm_to_vmem [thread:$0]  %s43_s1, 1024, %s45_s30, [#allocation6], %s1410_s5, %s1410_s5, %s1411_s6  }
   0xb   :  { %1399 = dma.done.wait [#allocation3], 4096  }
   0xc   :  { %1400 = vsyncadd [#allocation3], 4294963200 }
   0xd   :  { %1401 = dma.done.wait [#allocation6], 1040  }
   0xe   :  { %1402 = vsyncadd [#allocation6], 4294966256  ;;  %v1451_v0 = vld [vmem:[#allocation2 + $0xc0] sm:$0xff]  ;;  %v1460_v3 = vld [vmem:[#allocation2 + $0xc8] sm:$0xff]  ;;  %v1412_v32 = vmov 128.0   ;;  %s1053_s10 = sshll.u32 %s2534_s4, 4  ;;  %s1054_s10 = int_to_ptr.hbm [resolvable:$true] %s1053_s10 }
   0xf   :  { %v1453_v1 = vld [vmem:[#allocation2 + $0x80] sm:$0xff]  ;;  %143 = vadd.xlane.f32.xlu1 %v1451_v0  ;;  %v1462_v4 = vld [vmem:[#allocation2 + $0x88] sm:$0xff]  ;;  %v1473_v8 = vld [vmem:[#allocation2 + $0x90] sm:$0xff]  ;;  %1237 = vrcp.f32 %v1412_v32 }
  0x10   :  { %v1455_v2 = vld [vmem:[#allocation2] sm:$0xff]  ;;  %127 = vadd.xlane.f32.xlu0 %v1453_v1  ;;  %v1464_v5 = vld [vmem:[#allocation2 + $0x8] sm:$0xff]  ;;  %v1478_v9 = vld [vmem:[#allocation2 + $0xd0] sm:$0xff] }
  0x11   :  { %95 = vadd.xlane.f32.xlu2 %v1455_v2  ;;  %v1469_v6 = vld [vmem:[#allocation2 + $0x48] sm:$0xff]  ;;  %v1471_v7 = vld [vmem:[#allocation2 + $0x40] sm:$0xff]  ;;  %v1480_v10 = vld [vmem:[#allocation2 + $0x98] sm:$0xff] }
  0x12   :  { %v1482_v11 = vld [vmem:[#allocation2 + $0xd8] sm:$0xff]  ;;  %v1489_v13 = vld [vmem:[#allocation2 + $0x10] sm:$0xff]  ;;  %v1496_v15 = vld [vmem:[#allocation2 + $0xa0] sm:$0xff] }
  0x13   :  { %v1487_v12 = vld [vmem:[#allocation2 + $0x18] sm:$0xff]  ;;  %v1491_v14 = vld [vmem:[#allocation2 + $0x50] sm:$0xff]  ;;  %v1500_v17 = vld [vmem:[#allocation2 + $0xa8] sm:$0xff] }
  0x14   :  { %v1498_v16 = vld [vmem:[#allocation2 + $0x58] sm:$0xff]  ;;  %v1505_v18 = vld [vmem:[#allocation2 + $0xe8] sm:$0xff]  ;;  %v1507_v19 = vld [vmem:[#allocation2 + $0xe0] sm:$0xff] }
  0x15   :  { %v1509_v20 = vld [vmem:[#allocation2 + $0x20] sm:$0xff]  ;;  %v1516_v22 = vld [vmem:[#allocation2 + $0x28] sm:$0xff]  ;;  %v1523_v24 = vld [vmem:[#allocation2 + $0xb0] sm:$0xff]  ;;  %v1238_v33 = vpop.eup %1237 }
  0x16   :  { %v1514_v21 = vld [vmem:[#allocation2 + $0x60] sm:$0xff]  ;;  %v1518_v23 = vld [vmem:[#allocation2 + $0x68] sm:$0xff]  ;;  %v1525_v25 = vld [vmem:[#allocation2 + $0xf0] sm:$0xff]  ;;  %v160_v34 = vmul.f32 128.0, %v1238_v33  ;;  %vm164_vm0 = vweird.f32 %v1238_v33 }
  0x17   :  { %145 = vadd.xlane.f32.xlu1 %v1460_v3  ;;  %v1527_v26 = vld [vmem:[#allocation2 + $0xb8] sm:$0xff]  ;;  %v1534_v28 = vld [vmem:[#allocation2 + $0x30] sm:$0xff] }
  0x18   :  { %129 = vadd.xlane.f32.xlu0 %v1462_v4  ;;  %v1532_v27 = vld [vmem:[#allocation2 + $0xf8] sm:$0xff]  ;;  %v1536_v29 = vld [vmem:[#allocation2 + $0x70] sm:$0xff]  ;;  %v161_v35 = vsub.f32 1.0, %v160_v34 }
  0x19   :  { %97 = vadd.xlane.f32.xlu2 %v1464_v5  ;;  %v1541_v30 = vld [vmem:[#allocation2 + $0x38] sm:$0xff] }
  0x1a   :  { %v1543_v31 = vld [vmem:[#allocation2 + $0x78] sm:$0xff]  ;;  %v162_v36 = vmul.f32 %v1238_v33, %v161_v35 }
  0x1c   :  { %v163_v37 = vadd.f32 %v1238_v33, %v162_v36 }
  0x1e   :  { %v1547_v38 = vsel %vm164_vm0, %v1238_v33, %v163_v37 }
  0x1f   :  { %113 = vadd.xlane.f32.xlu1 %v1469_v6 }
  0x20   :  { %111 = vadd.xlane.f32.xlu0 %v1471_v7 }
  0x21   :  { %131 = vadd.xlane.f32.xlu2 %v1473_v8 }
  0x27   :  { %147 = vadd.xlane.f32.xlu1 %v1478_v9 }
  0x28   :  { %133 = vadd.xlane.f32.xlu0 %v1480_v10 }
  0x29   :  { %149 = vadd.xlane.f32.xlu2 %v1482_v11 }
  0x2f   :  { %101 = vadd.xlane.f32.xlu1 %v1487_v12 }
  0x30   :  { %99 = vadd.xlane.f32.xlu0 %v1489_v13 }
  0x31   :  { %115 = vadd.xlane.f32.xlu2 %v1491_v14 }
  0x37   :  { %135 = vadd.xlane.f32.xlu1 %v1496_v15 }
  0x38   :  { %117 = vadd.xlane.f32.xlu0 %v1498_v16 }
  0x39   :  { %137 = vadd.xlane.f32.xlu2 %v1500_v17 }
  0x3f   :  { %153 = vadd.xlane.f32.xlu1 %v1505_v18 }
  0x40   :  { %151 = vadd.xlane.f32.xlu0 %v1507_v19 }
  0x41   :  { %103 = vadd.xlane.f32.xlu2 %v1509_v20 }
  0x47   :  { %119 = vadd.xlane.f32.xlu1 %v1514_v21 }
  0x48   :  { %105 = vadd.xlane.f32.xlu0 %v1516_v22 }
  0x49   :  { %121 = vadd.xlane.f32.xlu2 %v1518_v23 }
  0x4f   :  { %139 = vadd.xlane.f32.xlu1 %v1523_v24 }
  0x50   :  { %155 = vadd.xlane.f32.xlu0 %v1525_v25 }
  0x51   :  { %141 = vadd.xlane.f32.xlu2 %v1527_v26 }
  0x57   :  { %157 = vadd.xlane.f32.xlu1 %v1532_v27 }
  0x58   :  { %107 = vadd.xlane.f32.xlu0 %v1534_v28 }
  0x59   :  { %123 = vadd.xlane.f32.xlu2 %v1536_v29 }
  0x5f   :  { %109 = vadd.xlane.f32.xlu1 %v1541_v30 }
  0x60   :  { %125 = vadd.xlane.f32.xlu0 %v1543_v31 }
  0x82   :  { %v144_v39 = vpop.xlane.xlu1 %143 }
  0x83   :  { %v128_v40 = vpop.xlane.xlu0 %127  ;;  %v190_v41 = vmul.f32 %v1547_v38, %v144_v39 }
  0x84   :  { %v182_v42 = vmul.f32 %v1547_v38, %v128_v40  ;;  %v96_v43 = vpop.xlane.xlu2 %95 }
  0x85   :  { %v1552_v44 = vsub.f32 %v1451_v0, %v190_v41  ;;  %v166_v48 = vmul.f32 %v1547_v38, %v96_v43 }
  0x86   :  { %v1555_v45 = vsub.f32 %v1453_v1, %v182_v42 }
  0x87   :  { %v254_v47 = vmul.f32 %v1552_v44, %v1552_v44  ;;  %v1565_v54 = vsub.f32 %v1455_v2, %v166_v48 }
  0x88   :  { %v246_v46 = vmul.f32 %v1555_v45, %v1555_v45 }
  0x89   :  { %310 = vadd.xlane.f32.xlu2 %v254_v47  ;;  %v230_v60 = vmul.f32 %v1565_v54, %v1565_v54 }
  0x8a   :  { %294 = vadd.xlane.f32.xlu0 %v246_v46  ;;  %v146_v49 = vpop.xlane.xlu1 %145 }
  0x8b   :  { %v130_v50 = vpop.xlane.xlu0 %129  ;;  %v191_v51 = vmul.f32 %v1547_v38, %v146_v49 }
  0x8c   :  { %v183_v52 = vmul.f32 %v1547_v38, %v130_v50  ;;  %v98_v53 = vpop.xlane.xlu2 %97 }
  0x8d   :  { %v1568_v55 = vsub.f32 %v1460_v3, %v191_v51  ;;  %v167_v57 = vmul.f32 %v1547_v38, %v98_v53 }
  0x8e   :  { %v1571_v56 = vsub.f32 %v1462_v4, %v183_v52 }
  0x8f   :  { %v255_v59 = vmul.f32 %v1568_v55, %v1568_v55  ;;  %v1581_v63 = vsub.f32 %v1464_v5, %v167_v57 }
  0x90   :  { %v247_v58 = vmul.f32 %v1571_v56, %v1571_v56 }
  0x91   :  { %262 = vadd.xlane.f32.xlu2 %v230_v60  ;;  %v231_v34 = vmul.f32 %v1581_v63, %v1581_v63 }
  0x92   :  { %296 = vadd.xlane.f32.xlu1 %v247_v58  ;;  %312 = vadd.xlane.f32.xlu0 %v255_v59  ;;  %v114_v61 = vpop.xlane.xlu1 %113 }
  0x93   :  { %v112_v62 = vpop.xlane.xlu0 %111  ;;  %v175_v0 = vmul.f32 %v1547_v38, %v114_v61 }
  0x94   :  { %v174_v1 = vmul.f32 %v1547_v38, %v112_v62  ;;  %v132_v2 = vpop.xlane.xlu2 %131 }
  0x95   :  { %v1586_v3 = vsub.f32 %v1469_v6, %v175_v0  ;;  %v184_v32 = vmul.f32 %v1547_v38, %v132_v2 }
  0x96   :  { %v1589_v4 = vsub.f32 %v1471_v7, %v174_v1 }
  0x97   :  { %v239_v5 = vmul.f32 %v1586_v3, %v1586_v3  ;;  %v1599_v36 = vsub.f32 %v1473_v8, %v184_v32 }
  0x98   :  { %v238_v33 = vmul.f32 %v1589_v4, %v1589_v4 }
  0x99   :  { %280 = vadd.xlane.f32.xlu2 %v239_v5  ;;  %v248_v46 = vmul.f32 %v1599_v36, %v1599_v36 }
  0x9a   :  { %278 = vadd.xlane.f32.xlu1 %v238_v33  ;;  %264 = vadd.xlane.f32.xlu0 %v231_v34  ;;  %v148_v35 = vpop.xlane.xlu1 %147 }
  0x9b   :  { %v134_v6 = vpop.xlane.xlu0 %133  ;;  %v192_v7 = vmul.f32 %v1547_v38, %v148_v35 }
  0x9c   :  { %v185_v37 = vmul.f32 %v1547_v38, %v134_v6  ;;  %v150_v39 = vpop.xlane.xlu2 %149 }
  0x9d   :  { %v1604_v40 = vsub.f32 %v1478_v9, %v192_v7  ;;  %v193_v42 = vmul.f32 %v1547_v38, %v150_v39 }
  0x9e   :  { %v1607_v41 = vsub.f32 %v1480_v10, %v185_v37 }
  0x9f   :  { %v256_v8 = vmul.f32 %v1604_v40, %v1604_v40  ;;  %v1617_v48 = vsub.f32 %v1482_v11, %v193_v42 }
  0xa0   :  { %v249_v43 = vmul.f32 %v1607_v41, %v1607_v41 }
  0xa1   :  { %v257_v58 = vmul.f32 %v1617_v48, %v1617_v48 }
  0xa2   :  { %314 = vadd.xlane.f32.xlu0 %v256_v8  ;;  %298 = vadd.xlane.f32.xlu1 %v248_v46  ;;  %v102_v47 = vpop.xlane.xlu1 %101 }
  0xa3   :  { %300 = vadd.xlane.f32.xlu2 %v249_v43  ;;  %v100_v9 = vpop.xlane.xlu0 %99  ;;  %v169_v10 = vmul.f32 %v1547_v38, %v102_v47 }
  0xa4   :  { %v168_v49 = vmul.f32 %v1547_v38, %v100_v9  ;;  %v116_v50 = vpop.xlane.xlu2 %115 }
  0xa5   :  { %v1622_v51 = vsub.f32 %v1487_v12, %v169_v10  ;;  %v176_v53 = vmul.f32 %v1547_v38, %v116_v50 }
  0xa6   :  { %v1625_v52 = vsub.f32 %v1489_v13, %v168_v49 }
  0xa7   :  { %v233_v11 = vmul.f32 %v1622_v51, %v1622_v51  ;;  %v1635_v60 = vsub.f32 %v1491_v14, %v176_v53 }
  0xa8   :  { %v232_v57 = vmul.f32 %v1625_v52, %v1625_v52 }
  0xa9   :  { %v240_v33 = vmul.f32 %v1635_v60, %v1635_v60 }
  0xaa   :  { %268 = vadd.xlane.f32.xlu0 %v233_v11  ;;  %316 = vadd.xlane.f32.xlu1 %v257_v58  ;;  %v136_v59 = vpop.xlane.xlu1 %135 }
  0xab   :  { %266 = vadd.xlane.f32.xlu2 %v232_v57  ;;  %v118_v12 = vpop.xlane.xlu0 %117  ;;  %v186_v13 = vmul.f32 %v1547_v38, %v136_v59 }
  0xac   :  { %v177_v61 = vmul.f32 %v1547_v38, %v118_v12  ;;  %v138_v62 = vpop.xlane.xlu2 %137 }
  0xad   :  { %v1640_v0 = vsub.f32 %v1496_v15, %v186_v13  ;;  %v187_v2 = vmul.f32 %v1547_v38, %v138_v62 }
  0xae   :  { %v1643_v1 = vsub.f32 %v1498_v16, %v177_v61 }
  0xaf   :  { %v250_v14 = vmul.f32 %v1640_v0, %v1640_v0  ;;  %v1653_v34 = vsub.f32 %v1500_v17, %v187_v2 }
  0xb0   :  { %v241_v32 = vmul.f32 %v1643_v1, %v1643_v1 }
  0xb1   :  { %v251_v43 = vmul.f32 %v1653_v34, %v1653_v34 }
  0xb2   :  { %302 = vadd.xlane.f32.xlu0 %v250_v14  ;;  %282 = vadd.xlane.f32.xlu1 %v240_v33  ;;  %v154_v5 = vpop.xlane.xlu1 %153 }
  0xb3   :  { %284 = vadd.xlane.f32.xlu2 %v241_v32  ;;  %v152_v15 = vpop.xlane.xlu0 %151  ;;  %v195_v16 = vmul.f32 %v1547_v38, %v154_v5 }
  0xb4   :  { %v194_v35 = vmul.f32 %v1547_v38, %v152_v15  ;;  %v104_v6 = vpop.xlane.xlu2 %103 }
  0xb5   :  { %v1658_v7 = vsub.f32 %v1505_v18, %v195_v16  ;;  %v170_v39 = vmul.f32 %v1547_v38, %v104_v6 }
  0xb6   :  { %v1661_v37 = vsub.f32 %v1507_v19, %v194_v35 }
  0xb7   :  { %v259_v17 = vmul.f32 %v1658_v7, %v1658_v7  ;;  %v1671_v46 = vsub.f32 %v1509_v20, %v170_v39 }
  0xb8   :  { %v258_v42 = vmul.f32 %v1661_v37, %v1661_v37 }
  0xb9   :  { %v234_v57 = vmul.f32 %v1671_v46, %v1671_v46 }
  0xba   :  { %320 = vadd.xlane.f32.xlu0 %v259_v17  ;;  %304 = vadd.xlane.f32.xlu1 %v251_v43  ;;  %v120_v8 = vpop.xlane.xlu1 %119 }
  0xbb   :  { %318 = vadd.xlane.f32.xlu2 %v258_v42  ;;  %v106_v18 = vpop.xlane.xlu0 %105  ;;  %v178_v19 = vmul.f32 %v1547_v38, %v120_v8 }
  0xbc   :  { %v171_v47 = vmul.f32 %v1547_v38, %v106_v18  ;;  %v122_v9 = vpop.xlane.xlu2 %121 }
  0xbd   :  { %v1676_v10 = vsub.f32 %v1514_v21, %v178_v19  ;;  %v179_v50 = vmul.f32 %v1547_v38, %v122_v9 }
  0xbe   :  { %v1679_v49 = vsub.f32 %v1516_v22, %v171_v47 }
  0xbf   :  { %v242_v20 = vmul.f32 %v1676_v10, %v1676_v10  ;;  %v1689_v58 = vsub.f32 %v1518_v23, %v179_v50  ;;  %v1106_v50 = vld [vmem:[#allocation7 + $0x38] sm:$0xff] }
  0xc0   :  { %v235_v53 = vmul.f32 %v1679_v49, %v1679_v49  ;;  %1203 = vmatpush.bf16.msra.mxu2 %v1106_v50  ;;  %1204 = vmatpush.bf16.msra.mxu3 %v1106_v50 }
  0xc1   :  { %2544 = vst [vmem:[#allocation12_spill] sm:$0xff] %v1689_v58  ;;  %v243_v23 = vmul.f32 %v1689_v58, %v1689_v58  ;;  %894 = vmatpush.bf16.msra.mxu0 %v1106_v50  ;;  %1202 = vmatpush.bf16.msra.mxu1 %v1106_v50 }
  0xc2   :  { %286 = vadd.xlane.f32.xlu0 %v242_v20  ;;  %270 = vadd.xlane.f32.xlu1 %v234_v57  ;;  %v140_v11 = vpop.xlane.xlu1 %139  ;;  %v1102_v20 = vld [vmem:[#allocation7 + $0x18] sm:$0xff]  ;;  %v1101_v57 = vld [vmem:[#allocation7 + $0x10] sm:$0xff] }
  0xc3   :  { %272 = vadd.xlane.f32.xlu2 %v235_v53  ;;  %v156_v21 = vpop.xlane.xlu0 %155  ;;  %v188_v22 = vmul.f32 %v1547_v38, %v140_v11  ;;  %v1103_v53 = vld [vmem:[#allocation7 + $0x20] sm:$0xff] }
  0xc4   :  { %v142_v59 = vpop.xlane.xlu2 %141  ;;  %v196_v62 = vmul.f32 %v1547_v38, %v156_v21 }
  0xc5   :  { %v189_v12 = vmul.f32 %v1547_v38, %v142_v59  ;;  %v1694_v13 = vsub.f32 %v1523_v24, %v188_v22 }
  0xc6   :  { %v1707_v33 = vsub.f32 %v1525_v25, %v196_v62 }
  0xc7   :  { %2545 = vst [vmem:[#allocation13_spill] sm:$0xff] %v1694_v13  ;;  %v1697_v61 = vsub.f32 %v1527_v26, %v189_v12  ;;  %v252_v2 = vmul.f32 %v1694_v13, %v1694_v13  ;;  %v1100_v12 = vld [vmem:[#allocation7 + $0x8] sm:$0xff] }
  0xc8   :  { %2547 = vst [vmem:[#allocation15_spill] sm:$0xff] %v1707_v33  ;;  %v260_v25 = vmul.f32 %v1707_v33, %v1707_v33 }
  0xc9   :  { %2546 = vst [vmem:[#allocation14_spill] sm:$0xff] %v1697_v61  ;;  %v253_v32 = vmul.f32 %v1697_v61, %v1697_v61 }
  0xca   :  { %288 = vadd.xlane.f32.xlu1 %v243_v23  ;;  %v158_v14 = vpop.xlane.xlu1 %157  ;;  %v1099_v23 = vld [vmem:[#allocation7] sm:$0xff] }
  0xcb   :  { %306 = vadd.xlane.f32.xlu2 %v252_v2  ;;  %308 = vadd.xlane.f32.xlu0 %v253_v32  ;;  %v108_v24 = vpop.xlane.xlu0 %107  ;;  %v197_v26 = vmul.f32 %v1547_v38, %v158_v14 }
  0xcc   :  { %v172_v5 = vmul.f32 %v1547_v38, %v108_v24  ;;  %v124_v15 = vpop.xlane.xlu2 %123 }
  0xcd   :  { %v1712_v16 = vsub.f32 %v1532_v27, %v197_v26  ;;  %v180_v6 = vmul.f32 %v1547_v38, %v124_v15 }
  0xce   :  { %v1715_v35 = vsub.f32 %v1534_v28, %v172_v5 }
  0xcf   :  { %2548 = vst [vmem:[#allocation16_spill] sm:$0xff] %v1712_v16  ;;  %v261_v39 = vmul.f32 %v1712_v16, %v1712_v16  ;;  %v1725_v43 = vsub.f32 %v1536_v29, %v180_v6 }
  0xd0   :  { %2549 = vst [vmem:[#allocation17_spill] sm:$0xff] %v1715_v35  ;;  %v236_v42 = vmul.f32 %v1715_v35, %v1715_v35 }
  0xd1   :  { %2550 = vst [vmem:[#allocation18_spill] sm:$0xff] %v1725_v43  ;;  %v244_v47 = vmul.f32 %v1725_v43, %v1725_v43 }
  0xd2   :  { %322 = vadd.xlane.f32.xlu1 %v260_v25  ;;  %v110_v17 = vpop.xlane.xlu1 %109 }
  0xd3   :  { %324 = vadd.xlane.f32.xlu2 %v261_v39  ;;  %274 = vadd.xlane.f32.xlu0 %v236_v42  ;;  %v126_v27 = vpop.xlane.xlu0 %125  ;;  %v173_v28 = vmul.f32 %v1547_v38, %v110_v17 }
  0xd4   :  { %v181_v8 = vmul.f32 %v1547_v38, %v126_v27 }
  0xd5   :  { %v1730_v18 = vsub.f32 %v1541_v30, %v173_v28  ;;  %v1105_v30 = vld [vmem:[#allocation7 + $0x30] sm:$0xff] }
  0xd6   :  { %v1733_v19 = vsub.f32 %v1543_v31, %v181_v8  ;;  %1206 = vmatpush.bf16.msra.mxu2 %v1105_v30  ;;  %1207 = vmatpush.bf16.msra.mxu3 %v1105_v30  ;;  %v1104_v31 = vld [vmem:[#allocation7 + $0x28] sm:$0xff] }
  0xd7   :  { %2551 = vst [vmem:[#allocation19_spill] sm:$0xff] %v1730_v18  ;;  %v237_v9 = vmul.f32 %v1730_v18, %v1730_v18  ;;  %895 = vmatpush.bf16.msra.mxu0 %v1105_v30  ;;  %1205 = vmatpush.bf16.msra.mxu1 %v1105_v30 }
  0xd8   :  { %2552 = vst [vmem:[#allocation20_spill] sm:$0xff] %v1733_v19  ;;  %v245_v29 = vmul.f32 %v1733_v19, %v1733_v19 }
  0xda   :  { %276 = vadd.xlane.f32.xlu1 %v237_v9  ;;  %1209 = vmatpush.bf16.msra.mxu2 %v1104_v31 }
  0xdb   :  { %292 = vadd.xlane.f32.xlu0 %v245_v29  ;;  %290 = vadd.xlane.f32.xlu2 %v244_v47 }
  0xdc   :  { %1210 = vmatpush.bf16.msra.mxu3 %v1104_v31  ;;  %896 = vmatpush.bf16.msra.mxu0 %v1104_v31 }
  0xdd   :  { %1208 = vmatpush.bf16.msra.mxu1 %v1104_v31 }
  0xde   :  { %1212 = vmatpush.bf16.msra.mxu2 %v1103_v53 }
  0xe0   :  { %1213 = vmatpush.bf16.msra.mxu3 %v1103_v53  ;;  %897 = vmatpush.bf16.msra.mxu0 %v1103_v53 }
  0xe1   :  { %1211 = vmatpush.bf16.msra.mxu1 %v1103_v53 }
  0xe2   :  { %1215 = vmatpush.bf16.msra.mxu2 %v1102_v20 }
  0xe4   :  { %1216 = vmatpush.bf16.msra.mxu3 %v1102_v20  ;;  %898 = vmatpush.bf16.msra.mxu0 %v1102_v20 }
  0xe5   :  { %1214 = vmatpush.bf16.msra.mxu1 %v1102_v20 }
  0xe6   :  { %1218 = vmatpush.bf16.msra.mxu2 %v1101_v57 }
  0xe8   :  { %1219 = vmatpush.bf16.msra.mxu3 %v1101_v57  ;;  %899 = vmatpush.bf16.msra.mxu0 %v1101_v57 }
  0xe9   :  { %1217 = vmatpush.bf16.msra.mxu1 %v1101_v57 }
  0xea   :  { %1221 = vmatpush.bf16.msra.mxu2 %v1100_v12 }
  0xec   :  { %1222 = vmatpush.bf16.msra.mxu3 %v1100_v12  ;;  %900 = vmatpush.bf16.msra.mxu0 %v1100_v12 }
  0xed   :  { %1220 = vmatpush.bf16.msra.mxu1 %v1100_v12 }
  0xee   :  { %1224 = vmatpush.bf16.msra.mxu2 %v1099_v23 }
  0xf0   :  { %1225 = vmatpush.bf16.msra.mxu3 %v1099_v23  ;;  %901 = vmatpush.bf16.msra.mxu0 %v1099_v23 }
  0xf1   :  { %1223 = vmatpush.bf16.msra.mxu1 %v1099_v23 }
  0xfc   :  { %v311_v21 = vpop.xlane.xlu2 %310 }
  0xfd   :  { %v295_v11 = vpop.xlane.xlu0 %294  ;;  %v350_v59 = vmul.f32 %v311_v21, %v1547_v38 }
  0xfe   :  { %v342_v22 = vmul.f32 %v295_v11, %v1547_v38 }
  0xff   :  { %v1745_v2 = vadd.f32 1e-06, %v350_v59 }
 0x100   :  { %v1743_v62 = vadd.f32 1e-06, %v342_v22 }
 0x101   :  { %vm636_vm9 = vweird.f32 %v1745_v2 }
 0x102   :  { %1239 = vrsqrt.f32 %v1743_v62  ;;  %vm556_vm2 = vweird.f32 %v1743_v62 }
 0x103   :  { %1241 = vrsqrt.f32 %v1745_v2 }
 0x104   :  { %v263_v5 = vpop.xlane.xlu2 %262 }
 0x105   :  { %v297_v32 = vpop.xlane.xlu1 %296  ;;  %v313_v14 = vpop.xlane.xlu0 %312  ;;  %v326_v25 = vmul.f32 %v263_v5, %v1547_v38 }
 0x106   :  { %v343_v24 = vmul.f32 %v297_v32, %v1547_v38  ;;  %v351_v26 = vmul.f32 %v313_v14, %v1547_v38 }
 0x107   :  { %v1765_v28 = vadd.f32 1e-06, %v326_v25 }
 0x108   :  { %v1751_v15 = vpop.eup %1239  ;;  %v1753_v6 = vadd.f32 1e-06, %v343_v24  ;;  %v1755_v39 = vadd.f32 1e-06, %v351_v26 }
 0x109   :  { %v551_v42 = vmul.f32 %v1751_v15, %v1743_v62  ;;  %v1761_v17 = vpop.eup %1241  ;;  %vm557_vm1 = vweird.f32 %v1751_v15  ;;  %vm396_vm13 = vweird.f32 %v1765_v28 }
 0x10a   :  { %1243 = vrsqrt.f32 %v1753_v6  ;;  %v631_v9 = vmul.f32 %v1761_v17, %v1745_v2  ;;  %vm1811_vm3 = vmor %vm556_vm2, %vm557_vm1  ;;  %vm637_vm4 = vweird.f32 %v1761_v17  ;;  %vm566_vm6 = vweird.f32 %v1753_v6 }
 0x10b   :  { %1245 = vrsqrt.f32 %v1755_v39  ;;  %v552_v27 = vmul.f32 %v1751_v15, %v551_v42  ;;  %vm1861_vm10 = vmor %vm636_vm9, %vm637_vm4  ;;  %vm646_vm11 = vweird.f32 %v1755_v39 }
 0x10c   :  { %v281_v30 = vpop.xlane.xlu2 %280  ;;  %1247 = vrsqrt.f32 %v1765_v28  ;;  %v632_v12 = vmul.f32 %v1761_v17, %v631_v9 }
 0x10d   :  { %v279_v8 = vpop.xlane.xlu1 %278  ;;  %v265_v47 = vpop.xlane.xlu0 %264  ;;  %v335_v31 = vmul.f32 %v281_v30, %v1547_v38  ;;  %v553_v20 = vmul.f32 0.5, %v552_v27 }
 0x10e   :  { %v334_v29 = vmul.f32 %v279_v8, %v1547_v38  ;;  %v327_v50 = vmul.f32 %v265_v47, %v1547_v38  ;;  %v633_v27 = vmul.f32 0.5, %v632_v12 }
 0x10f   :  { %v1783_v59 = vadd.f32 1e-06, %v335_v31  ;;  %v554_v14 = vsub.f32 1.5, %v553_v20 }
 0x110   :  { %v1772_v53 = vpop.eup %1243  ;;  %v1775_v57 = vadd.f32 1e-06, %v334_v29  ;;  %v1777_v11 = vadd.f32 1e-06, %v327_v50 }
 0x111   :  { %v1779_v21 = vpop.eup %1245  ;;  %v561_v22 = vmul.f32 %v1772_v53, %v1753_v6  ;;  %v555_v50 = vmul.f32 %v1751_v15, %v554_v14  ;;  %vm567_vm5 = vweird.f32 %v1772_v53  ;;  %v1847_v14 = vld [vmem:[#allocation5] ss:$0 sm:$0xff]  ;;  %vm486_vm1 = vweird.f32 %v1783_v59 }
 0x112   :  { %v641_v23 = vmul.f32 %v1779_v21, %v1755_v39  ;;  %1249 = vrsqrt.f32 %v1775_v57  ;;  %v1793_v42 = vpop.eup %1247  ;;  %vm1833_vm7 = vmor %vm566_vm6, %vm567_vm5  ;;  %vm647_vm8 = vweird.f32 %v1779_v21  ;;  %v1881_v39 = vld [vmem:[%s2532_s2] ss:$0 sm:$0xff]  ;;  %vm476_vm15 = vweird.f32 %v1775_v57  ;;  %s1413_s2 = smov [#allocation8]  }
 0x113   :  { %v562_v32 = vmul.f32 %v1772_v53, %v561_v22  ;;  %1251 = vrsqrt.f32 %v1777_v11  ;;  %v391_v22 = vmul.f32 %v1793_v42, %v1765_v28  ;;  %vm1871_vm12 = vmor %vm646_vm11, %vm647_vm8  ;;  %vm397_vm14 = vweird.f32 %v1793_v42  ;;  %s1051_s7 = sshll.u32 %s1413_s2, 4  ;;  %s1052_s7 = int_to_ptr.vmem [resolvable:$true] %s1051_s7 }
 0x114   :  { %v642_v24 = vmul.f32 %v1779_v21, %v641_v23  ;;  %1253 = vrsqrt.f32 %v1783_v59  ;;  %vm406_vm0 = vweird.f32 %v1777_v11  ;;  %vm1941_vm4 = vmor %vm396_vm13, %vm397_vm14 }
 0x115   :  { %v563_v26 = vmul.f32 0.5, %v562_v32  ;;  %v315_v5 = vpop.xlane.xlu0 %314  ;;  %v299_v25 = vpop.xlane.xlu1 %298  ;;  %v634_v32 = vsub.f32 1.5, %v633_v27  ;;  %v559_v27 = vsel %vm1811_vm3, %v1751_v15, %v555_v50 }
 0x116   :  { %v344_v8 = vmul.f32 %v299_v25, %v1547_v38  ;;  %v301_v47 = vpop.xlane.xlu2 %300  ;;  %v643_v29 = vmul.f32 0.5, %v642_v24  ;;  %v352_v12 = vmul.f32 %v315_v5, %v1547_v38 }
 0x117   :  { %v564_v9 = vsub.f32 1.5, %v563_v26  ;;  %v345_v31 = vmul.f32 %v301_v47, %v1547_v38  ;;  %v635_v19 = vmul.f32 %v1761_v17, %v634_v32  ;;  %v726_v32 = vmul.f32 %v559_v27, %v1555_v45 }
 0x118   :  { %v1798_v30 = vadd.f32 1e-06, %v344_v8  ;;  %v1801_v20 = vpop.eup %1249  ;;  %v644_v25 = vsub.f32 1.5, %v643_v29  ;;  %v392_v8 = vmul.f32 %v1793_v42, %v391_v22 }
 0x119   :  { %v1806_v23 = vpop.eup %1251  ;;  %v565_v26 = vmul.f32 %v1772_v53, %v564_v9  ;;  %v1821_v62 = vadd.f32 1e-06, %v345_v31  ;;  %v471_v47 = vmul.f32 %v1801_v20, %v1775_v57  ;;  %v1830_v9 = vadd.f32 1e-06, %v352_v12 }
 0x11a   :  { %v1809_v24 = vpop.eup %1253  ;;  %v401_v5 = vmul.f32 %v1806_v23, %v1777_v11  ;;  %1255 = vrsqrt.f32 %v1798_v30  ;;  %v645_v22 = vmul.f32 %v1779_v21, %v644_v25  ;;  %v393_v25 = vmul.f32 0.5, %v392_v8 }
 0x11b   :  { %v481_v15 = vmul.f32 %v1809_v24, %v1783_v59  ;;  %1257 = vrsqrt.f32 %v1821_v62  ;;  %v569_v12 = vsel %vm1833_vm7, %v1772_v53, %v565_v26  ;;  %v472_v33 = vmul.f32 %v1801_v20, %v471_v47 }
 0x11c   :  { %v402_v18 = vmul.f32 %v1806_v23, %v401_v5  ;;  %1259 = vrsqrt.f32 %v1830_v9  ;;  %v727_v2 = vmul.f32 %v569_v12, %v1571_v56  ;;  %v762_v27 = vmul.f32 %v1847_v14, %v726_v32 }
 0x11d   :  { %v269_v29 = vpop.xlane.xlu0 %268  ;;  %v317_v43 = vpop.xlane.xlu1 %316  ;;  %v639_v56 = vsel %vm1861_vm10, %v1761_v17, %v635_v19  ;;  %v473_v12 = vmul.f32 0.5, %v472_v33  ;;  %vm407_vm2 = vweird.f32 %v1806_v23  ;;  %vm477_vm3 = vweird.f32 %v1801_v20 }
 0x11e   :  { %v329_v6 = vmul.f32 %v269_v29, %v1547_v38  ;;  %v267_v50 = vpop.xlane.xlu2 %266  ;;  %v353_v16 = vmul.f32 %v317_v43, %v1547_v38  ;;  %v482_v43 = vmul.f32 %v1809_v24, %v481_v15  ;;  %v403_v47 = vmul.f32 0.5, %v402_v18  ;;  %vm1950_vm6 = vmor %vm406_vm0, %vm407_vm2 }
 0x11f   :  { %v328_v29 = vmul.f32 %v267_v50, %v1547_v38  ;;  %v394_v50 = vsub.f32 1.5, %v393_v25  ;;  %v734_v18 = vmul.f32 %v639_v56, %v1552_v44  ;;  %v798_v33 = vadd.f32 %v1881_v39, %v762_v27  ;;  %vm1962_vm7 = vmor %vm476_vm15, %vm477_vm3 }
 0x120   :  { %v1850_v35 = vadd.f32 1e-06, %v329_v6  ;;  %v1857_v53 = vpop.eup %1255  ;;  %v1888_v31 = vadd.f32 1e-06, %v353_v16  ;;  %v649_v6 = vsel %vm1871_vm12, %v1779_v21, %v645_v22  ;;  %v483_v17 = vmul.f32 0.5, %v482_v43 }
 0x121   :  { %v571_v5 = vmul.f32 %v1857_v53, %v1798_v30  ;;  %v1886_v8 = vpop.eup %1257  ;;  %v1890_v15 = vadd.f32 1e-06, %v328_v29  ;;  %v763_v16 = vmul.f32 %v1847_v14, %v727_v2  ;;  %v735_v22 = vmul.f32 %v649_v6, %v1568_v55 }
 0x122   :  { %1261 = vrsqrt.f32 %v1850_v35  ;;  %v581_v19 = vmul.f32 %v1886_v8, %v1821_v62  ;;  %v1902_v29 = vpop.eup %1259  ;;  %v404_v45 = vsub.f32 1.5, %v403_v47  ;;  %v770_v43 = vmul.f32 %v1847_v14, %v734_v18 }
 0x123   :  { %1263 = vrsqrt.f32 %v1890_v15  ;;  %v572_v21 = vmul.f32 %v1857_v53, %v571_v5  ;;  %v799_v44 = vadd.f32 %v1881_v39, %v763_v16  ;;  %v395_v56 = vmul.f32 %v1793_v42, %v394_v50 }
 0x124   :  { %1265 = vrsqrt.f32 %v1888_v31  ;;  %v582_v5 = vmul.f32 %v1886_v8, %v581_v19  ;;  %v474_v55 = vsub.f32 1.5, %v473_v12  ;;  %v484_v6 = vsub.f32 1.5, %v483_v17 }
 0x125   :  { %v303_v32 = vpop.xlane.xlu0 %302  ;;  %v283_v2 = vpop.xlane.xlu1 %282  ;;  %v822_v61 = vpack.c.bf16 %v799_v44, %v798_v33  ;;  %v771_v47 = vmul.f32 %v1847_v14, %v735_v22  ;;  %v651_v16 = vmul.f32 %v1902_v29, %v1830_v9  ;;  %v573_v13 = vmul.f32 0.5, %v572_v21 }
 0x126   :  { %v285_v26 = vpop.xlane.xlu2 %284  ;;  %v346_v27 = vmul.f32 %v303_v32, %v1547_v38  ;;  %v336_v50 = vmul.f32 %v283_v2, %v1547_v38  ;;  %v405_v19 = vmul.f32 %v1806_v23, %v404_v45  ;;  %v806_v12 = vadd.f32 %v1881_v39, %v770_v43 }
 0x127   :  { %942 = vmatmul.bf16.vlgmr.msra.gmra.mxu2 %v822_v61  ;;  %v807_v17 = vadd.f32 %v1881_v39, %v771_v47  ;;  %v583_v32 = vmul.f32 0.5, %v582_v5  ;;  %v475_v45 = vmul.f32 %v1801_v20, %v474_v55  ;;  %v485_v44 = vmul.f32 %v1809_v24, %v484_v6 }
 0x128   :  { %v1909_v25 = vpop.eup %1261  ;;  %v1933_v33 = vadd.f32 1e-06, %v346_v27  ;;  %vm487_vm5 = vweird.f32 %v1809_v24  ;;  %v652_v5 = vmul.f32 %v1902_v29, %v651_v16  ;;  %v574_v28 = vsub.f32 1.5, %v573_v13 }
 0x129   :  { %v421_v18 = vmul.f32 %v1909_v25, %v1850_v35  ;;  %v1924_v58 = vpop.eup %1263  ;;  %v826_v43 = vpack.c.bf16 %v807_v17, %v806_v12  ;;  %v1956_v47 = vadd.f32 1e-06, %v336_v50  ;;  %vm576_vm8 = vweird.f32 %v1798_v30  ;;  %vm1977_vm9 = vmor %vm486_vm1, %vm487_vm5 }
 0x12a   :  { %v411_v21 = vmul.f32 %v1924_v58, %v1890_v15  ;;  %v1935_v22 = vpop.eup %1265  ;;  %v337_v6 = vmul.f32 %v285_v26, %v1547_v38  ;;  %v399_v13 = vsel %vm1941_vm4, %v1793_v42, %v395_v56  ;;  %v409_v16 = vsel %vm1950_vm6, %v1806_v23, %v405_v19 }
 0x12b   :  { %v422_v27 = vmul.f32 %v1909_v25, %v421_v18  ;;  %962 = vmatmul.bf16.vlgmr.msra.gmra.mxu3 %v826_v43  ;;  %v584_v18 = vsub.f32 1.5, %v583_v32  ;;  %vm586_vm10 = vweird.f32 %v1821_v62  ;;  %v661_v26 = vmul.f32 %v1935_v22, %v1888_v31 }
 0x12c   :  { %v412_v11 = vmul.f32 %v1924_v58, %v411_v21  ;;  %1267 = vrsqrt.f32 %v1933_v33  ;;  %v710_v42 = vmul.f32 %v399_v13, %v1565_v54  ;;  %v1986_v50 = vadd.f32 1e-06, %v337_v6 }
 0x12d   :  { %v321_v56 = vpop.xlane.xlu0 %320  ;;  %v711_v23 = vmul.f32 %v409_v16, %v1581_v63  ;;  %v479_v59 = vsel %vm1962_vm7, %v1801_v20, %v475_v45  ;;  %v489_v19 = vsel %vm1977_vm9, %v1809_v24, %v485_v44  ;;  %v305_v12 = vpop.xlane.xlu1 %304  ;;  %v423_v32 = vmul.f32 0.5, %v422_v27 }
 0x12e   :  { %v319_v17 = vpop.xlane.xlu2 %318  ;;  %1269 = vrsqrt.f32 %v1956_v47  ;;  %v746_v54 = vmul.f32 %v1847_v14, %v710_v42  ;;  %v718_v21 = vmul.f32 %v479_v59, %v1589_v4  ;;  %v413_v61 = vmul.f32 0.5, %v412_v11 }
 0x12f   :  { %1271 = vrsqrt.f32 %v1986_v50  ;;  %v747_v63 = vmul.f32 %v1847_v14, %v711_v23  ;;  %v719_v20 = vmul.f32 %v489_v19, %v1586_v3  ;;  %v575_v45 = vmul.f32 %v1857_v53, %v574_v28 }
 0x130   :  { %vm577_vm11 = vweird.f32 %v1857_v53  ;;  %v585_v24 = vmul.f32 %v1886_v8, %v584_v18  ;;  %vm587_vm12 = vweird.f32 %v1886_v8  ;;  %vm426_vm13 = vweird.f32 %v1850_v35 }
 0x131   :  { %v662_v44 = vmul.f32 %v1935_v22, %v661_v26  ;;  %v782_v4 = vadd.f32 %v1881_v39, %v746_v54  ;;  %v783_v43 = vadd.f32 %v1881_v39, %v747_v63  ;;  %v754_v2 = vmul.f32 %v1847_v14, %v718_v21  ;;  %vm2023_vm14 = vmor %vm576_vm8, %vm577_vm11 }
 0x132   :  { %v2010_v27 = vpop.eup %1267  ;;  %v424_v3 = vsub.f32 1.5, %v423_v32  ;;  %v755_v28 = vmul.f32 %v1847_v14, %v719_v20  ;;  %v355_v55 = vmul.f32 %v321_v56, %v1547_v38  ;;  %v347_v11 = vmul.f32 %v305_v12, %v1547_v38  ;;  %vm2038_vm15 = vmor %vm586_vm10, %vm587_vm12 }
 0x133   :  { %v414_v6 = vsub.f32 1.5, %v413_v61  ;;  %v814_v13 = vpack.c.bf16 %v783_v43, %v782_v4  ;;  %v790_v16 = vadd.f32 %v1881_v39, %v754_v2  ;;  %v354_v57 = vmul.f32 %v319_v17, %v1547_v38 }
 0x134   :  { %v2017_v18 = vpop.eup %1269  ;;  %v653_v26 = vmul.f32 0.5, %v652_v5  ;;  %v791_v56 = vadd.f32 %v1881_v39, %v755_v28  ;;  %v2028_v23 = vadd.f32 1e-06, %v355_v55  ;;  %v2030_v59 = vadd.f32 1e-06, %v347_v11 }
 0x135   :  { %v2032_v19 = vpop.eup %1271  ;;  %vm427_vm0 = vweird.f32 %v1909_v25  ;;  %v663_v30 = vmul.f32 0.5, %v662_v44  ;;  %vm416_vm1 = vweird.f32 %v1890_v15  ;;  %902 = vmatmul.bf16.vlgmr.msra.gmra.mxu0 %v814_v13  ;;  %v2044_v12 = vadd.f32 1e-06, %v354_v57  ;;  %v287_v21 = vpop.xlane.xlu0 %286 }
 0x136   :  { %vm657_vm2 = vweird.f32 %v1902_v29  ;;  %v591_v17 = vmul.f32 %v2010_v27, %v1933_v33  ;;  %v818_v32 = vpack.c.bf16 %v791_v56, %v790_v16  ;;  %v579_v62 = vsel %vm2023_vm14, %v1857_v53, %v575_v45  ;;  %v271_v20 = vpop.xlane.xlu1 %270  ;;  %v273_v44 = vpop.xlane.xlu2 %272  ;;  %vm2069_vm5 = vmor %vm426_vm13, %vm427_vm0 }
 0x137   :  { %v589_v54 = vsel %vm2038_vm15, %v1886_v8, %v585_v24  ;;  %v425_v61 = vmul.f32 %v1909_v25, %v424_v3  ;;  %v415_v63 = vmul.f32 %v1924_v58, %v414_v6  ;;  %vm417_vm3 = vweird.f32 %v1924_v58 }
 0x138   :  { %1273 = vrsqrt.f32 %v2028_v23  ;;  %v654_v4 = vsub.f32 1.5, %v653_v26  ;;  %vm656_vm4 = vweird.f32 %v1830_v9  ;;  %v491_v53 = vmul.f32 %v2017_v18, %v1956_v47  ;;  %922 = vmatmul.bf16.vlgmr.msra.gmra.mxu1 %v818_v32  ;;  %vm2080_vm6 = vmor %vm416_vm1, %vm417_vm3 }
 0x139   :  { %v501_v8 = vmul.f32 %v2032_v19, %v1986_v50  ;;  %1275 = vrsqrt.f32 %v2030_v59  ;;  %v664_v24 = vsub.f32 1.5, %v663_v30  ;;  %v728_v43 = vmul.f32 %v579_v62, %v1599_v36  ;;  %vm2127_vm8 = vmor %vm656_vm4, %vm657_vm2 }
 0x13a   :  { %1277 = vrsqrt.f32 %v2044_v12  ;;  %v729_v2 = vmul.f32 %v589_v54, %v1607_v41  ;;  %v592_v35 = vmul.f32 %v2010_v27, %v591_v17  ;;  %v338_v28 = vmul.f32 %v287_v21, %v1547_v38 }
 0x13b   :  { %v330_v55 = vmul.f32 %v271_v20, %v1547_v38  ;;  %v331_v11 = vmul.f32 %v273_v44, %v1547_v38  ;;  %v764_v36 = vmul.f32 %v1847_v14, %v728_v43  ;;  %v419_v15 = vsel %vm2080_vm6, %v1924_v58, %v415_v63 }
 0x13c   :  { %v765_v41 = vmul.f32 %v1847_v14, %v729_v2  ;;  %v429_v6 = vsel %vm2069_vm5, %v1909_v25, %v425_v61  ;;  %v492_v13 = vmul.f32 %v2017_v18, %v491_v53  ;;  %v502_v16 = vmul.f32 %v2032_v19, %v501_v8 }
 0x13d   :  { %v2098_v57 = vadd.f32 1e-06, %v338_v28  ;;  %v2100_v26 = vadd.f32 1e-06, %v330_v55  ;;  %v655_v56 = vmul.f32 %v1902_v29, %v654_v4  ;;  %v800_v5 = vadd.f32 %v1881_v39, %v764_v36 }
 0x13e   :  { %v2102_v42 = vpop.eup %1273  ;;  %v801_v58 = vadd.f32 %v1881_v39, %v765_v41  ;;  %v2107_v30 = vadd.f32 1e-06, %v331_v11  ;;  %vm667_vm7 = vweird.f32 %v1935_v22  ;;  %v712_v25 = vmul.f32 %v419_v15, %v1625_v52  ;;  %v307_v15 = vpop.xlane.xlu2 %306 }
 0x13f   :  { %v2109_v17 = vpop.eup %1275  ;;  %1279 = vrsqrt.f32 %v2098_v57  ;;  %v713_v32 = vmul.f32 %v429_v6, %v1622_v51  ;;  %v665_v54 = vmul.f32 %v1935_v22, %v664_v24  ;;  %v593_v21 = vmul.f32 0.5, %v592_v35  ;;  %v289_v24 = vpop.xlane.xlu1 %288 }
 0x140   :  { %v2115_v62 = vpop.eup %1277  ;;  %v601_v61 = vmul.f32 %v2109_v17, %v2030_v59  ;;  %v823_v63 = vpack.c.bf16 %v801_v58, %v800_v5  ;;  %v493_v20 = vmul.f32 0.5, %v492_v13  ;;  %v503_v44 = vmul.f32 0.5, %v502_v16  ;;  %v309_v35 = vpop.xlane.xlu0 %308 }
 0x141   :  { %v671_v4 = vmul.f32 %v2115_v62, %v2044_v12  ;;  %1281 = vrsqrt.f32 %v2100_v26  ;;  %vm666_vm9 = vweird.f32 %v1888_v31  ;;  %v681_v52 = vmul.f32 %v2102_v42, %v2028_v23 }
 0x142   :  { %947 = vmatmul.bf16.gmra.mxu2 %v823_v63  ;;  %1283 = vrsqrt.f32 %v2107_v30  ;;  %vm2137_vm10 = vmor %vm666_vm9, %vm667_vm7  ;;  %v602_v9 = vmul.f32 %v2109_v17, %v601_v61  ;;  %v748_v8 = vmul.f32 %v1847_v14, %v712_v25  ;;  %v749_v45 = vmul.f32 %v1847_v14, %v713_v32 }
 0x143   :  { %v594_v31 = vsub.f32 1.5, %v593_v21  ;;  %vm496_vm11 = vweird.f32 %v1956_v47  ;;  %v672_v43 = vmul.f32 %v2115_v62, %v671_v4  ;;  %v659_v2 = vsel %vm2127_vm8, %v1902_v29, %v655_v56 }
 0x144   :  { %v669_v3 = vsel %vm2137_vm10, %v1935_v22, %v665_v54  ;;  %v494_v55 = vsub.f32 1.5, %v493_v20  ;;  %v504_v11 = vsub.f32 1.5, %v503_v44  ;;  %v784_v36 = vadd.f32 %v1881_v39, %v748_v8 }
 0x145   :  { %v2152_v28 = vpop.eup %1279  ;;  %v785_v41 = vadd.f32 %v1881_v39, %v749_v45  ;;  %vm597_vm12 = vweird.f32 %v2010_v27  ;;  %vm506_vm13 = vweird.f32 %v1986_v50  ;;  %v682_v29 = vmul.f32 %v2102_v42, %v681_v52 }
 0x146   :  { %v511_v6 = vmul.f32 %v2152_v28, %v2098_v57  ;;  %v736_v22 = vmul.f32 %v659_v2, %v1604_v40  ;;  %v339_v13 = vmul.f32 %v289_v24, %v1547_v38  ;;  %vm497_vm14 = vweird.f32 %v2017_v18 }
 0x147   :  { %v2163_v16 = vpop.eup %1281  ;;  %v603_v56 = vmul.f32 0.5, %v602_v9  ;;  %v815_v5 = vpack.c.bf16 %v785_v41, %v784_v36  ;;  %v737_v58 = vmul.f32 %v669_v3, %v1617_v48  ;;  %v2170_v32 = vmul.f32 %v2010_v27, %v594_v31  ;;  %vm2198_vm2 = vmor %vm496_vm11, %vm497_vm14  ;;  %v323_v36 = vpop.xlane.xlu1 %322 }
 0x148   :  { %v2167_v25 = vpop.eup %1283  ;;  %vm596_vm15 = vweird.f32 %v1933_v33  ;;  %vm507_vm0 = vweird.f32 %v2032_v19  ;;  %v673_v40 = vmul.f32 0.5, %v672_v43  ;;  %v431_v54 = vmul.f32 %v2163_v16, %v2100_v26  ;;  %v275_v41 = vpop.xlane.xlu0 %274 }
 0x149   :  { %v495_v21 = vmul.f32 %v2017_v18, %v494_v55  ;;  %v505_v61 = vmul.f32 %v2032_v19, %v504_v11  ;;  %v512_v63 = vmul.f32 %v2152_v28, %v511_v6  ;;  %907 = vmatmul.bf16.gmra.mxu0 %v815_v5  ;;  %v772_v48 = vmul.f32 %v1847_v14, %v736_v22  ;;  %vm508_vm6 = vmor %vm506_vm13, %vm507_vm0  ;;  %v325_v22 = vpop.xlane.xlu2 %324 }
 0x14a   :  { %v2180_v20 = vmul.f32 0.5, %v682_v29  ;;  %vm606_vm1 = vweird.f32 %v2030_v59  ;;  %v441_v44 = vmul.f32 %v2167_v25, %v2107_v30  ;;  %v773_v4 = vmul.f32 %v1847_v14, %v737_v58  ;;  %vm2230_vm9 = vmor %vm596_vm15, %vm597_vm12 }
 0x14b   :  { %v2186_v51 = vadd.f32 1e-06, %v339_v13  ;;  %v604_v52 = vsub.f32 1.5, %v603_v56  ;;  %v432_v53 = vmul.f32 %v2163_v16, %v431_v54  ;;  %v349_v9 = vmul.f32 %v309_v35, %v1547_v38 }
 0x14c   :  { %v348_v8 = vmul.f32 %v307_v15, %v1547_v38  ;;  %v674_v45 = vsub.f32 1.5, %v673_v40  ;;  %v808_v24 = vadd.f32 %v1881_v39, %v772_v48  ;;  %v809_v31 = vadd.f32 %v1881_v39, %v773_v4 }
 0x14d   :  { %1285 = vrsqrt.f32 %v2186_v51  ;;  %vm607_vm3 = vweird.f32 %v2109_v17  ;;  %v513_v2 = vmul.f32 0.5, %v512_v63  ;;  %v2203_v3 = vadd.f32 1e-06, %v349_v9 }
 0x14e   :  { %v2205_v35 = vadd.f32 1e-06, %v348_v8  ;;  %vm687_vm4 = vweird.f32 %v2102_v42  ;;  %vm677_vm5 = vweird.f32 %v2115_v62  ;;  %v442_v55 = vmul.f32 %v2167_v25, %v441_v44  ;;  %vm2249_vm10 = vmor %vm606_vm1, %vm607_vm3 }
 0x14f   :  { %v827_v11 = vpack.c.bf16 %v809_v31, %v808_v24  ;;  %v499_v47 = vsel %vm2198_vm2, %v2017_v18, %v495_v21  ;;  %v684_v15 = vsub.f32 1.5, %v2180_v20  ;;  %v605_v29 = vmul.f32 %v2109_v17, %v604_v52 }
 0x150   :  { %vm676_vm7 = vweird.f32 %v2044_v12  ;;  %v433_v6 = vmul.f32 0.5, %v432_v53  ;;  %1287 = vrsqrt.f32 %v2203_v3  ;;  %vm686_vm8 = vweird.f32 %v2028_v23 }
 0x151   :  { %v675_v18 = vmul.f32 %v2115_v62, %v674_v45  ;;  %967 = vmatmul.bf16.gmra.mxu3 %v827_v11  ;;  %1289 = vrsqrt.f32 %v2205_v35  ;;  %v509_v50 = vsel %vm508_vm6, %v2032_v19, %v505_v61  ;;  %v720_v13 = vmul.f32 %v499_v47, %v1635_v60  ;;  %vm2285_vm12 = vmor %vm676_vm7, %vm677_vm5 }
 0x152   :  { %v514_v5 = vsub.f32 1.5, %v513_v2  ;;  %v721_v58 = vmul.f32 %v509_v50, %v1643_v1  ;;  %v356_v40 = vmul.f32 %v323_v36, %v1547_v38  ;;  %v332_v54 = vmul.f32 %v275_v41, %v1547_v38  ;;  %vm2300_vm14 = vmor %vm686_vm8, %vm687_vm4 }
 0x153   :  { %v2237_v21 = vpop.eup %1285  ;;  %v443_v19 = vmul.f32 0.5, %v442_v55  ;;  %v756_v60 = vmul.f32 %v1847_v14, %v720_v13  ;;  %v357_v61 = vmul.f32 %v325_v22, %v1547_v38  ;;  %v599_v33 = vsel %vm2230_vm9, %v2010_v27, %v2170_v32 }
 0x154   :  { %v434_v63 = vsub.f32 1.5, %v433_v6  ;;  %v521_v48 = vmul.f32 %v2237_v21, %v2186_v51  ;;  %v757_v20 = vmul.f32 %v1847_v14, %v721_v58  ;;  %v2256_v44 = vadd.f32 1e-06, %v356_v40 }
 0x155   :  { %v792_v4 = vadd.f32 %v1881_v39, %v756_v60  ;;  %v2259_v52 = vadd.f32 1e-06, %v332_v54  ;;  %v2261_v27 = vadd.f32 1e-06, %v357_v61  ;;  %v609_v59 = vsel %vm2249_vm10, %v2109_v17, %v605_v29 }
 0x156   :  { %v2266_v32 = vpop.eup %1287  ;;  %v522_v53 = vmul.f32 %v2237_v21, %v521_v48  ;;  %v793_v9 = vadd.f32 %v1881_v39, %v757_v20  ;;  %1291 = vrsqrt.f32 %v2256_v44  ;;  %v730_v8 = vmul.f32 %v599_v33, %v1640_v0  ;;  %v293_v48 = vpop.xlane.xlu0 %292 }
 0x157   :  { %v2272_v45 = vpop.eup %1289  ;;  %v685_v24 = vmul.f32 %v2102_v42, %v684_v15  ;;  %v444_v31 = vsub.f32 1.5, %v443_v19  ;;  %v621_v43 = vmul.f32 %v2266_v32, %v2203_v3  ;;  %1293 = vrsqrt.f32 %v2259_v52  ;;  %v277_v19 = vpop.xlane.xlu1 %276 }
 0x158   :  { %vm437_vm11 = vweird.f32 %v2163_v16  ;;  %v523_v17 = vmul.f32 0.5, %v522_v53  ;;  %v611_v2 = vmul.f32 %v2272_v45, %v2205_v35  ;;  %v819_v55 = vpack.c.bf16 %v793_v9, %v792_v4  ;;  %v291_v20 = vpop.xlane.xlu2 %290 }
 0x159   :  { %v2290_v11 = vmul.f32 %v2152_v28, %v514_v5  ;;  %vm447_vm13 = vweird.f32 %v2167_v25  ;;  %v622_v47 = vmul.f32 %v2266_v32, %v621_v43  ;;  %1295 = vrsqrt.f32 %v2261_v27 }
 0x15a   :  { %v731_v36 = vmul.f32 %v609_v59, %v1653_v34  ;;  %vm517_vm15 = vweird.f32 %v2152_v28  ;;  %v2306_v41 = vmul.f32 %v2163_v16, %v434_v63  ;;  %vm436_vm0 = vweird.f32 %v2100_v26  ;;  %927 = vmatmul.bf16.gmra.mxu1 %v819_v55 }
 0x15b   :  { %v612_v15 = vmul.f32 %v2272_v45, %v611_v2  ;;  %v766_v34 = vmul.f32 %v1847_v14, %v730_v8  ;;  %v679_v23 = vsel %vm2285_vm12, %v2115_v62, %v675_v18  ;;  %v2315_v29 = vmul.f32 %v2167_v25, %v444_v31  ;;  %vm2361_vm10 = vmor %vm436_vm0, %vm437_vm11 }
 0x15c   :  { %vm446_vm1 = vweird.f32 %v2107_v30  ;;  %v767_v6 = vmul.f32 %v1847_v14, %v731_v36  ;;  %v689_v22 = vsel %vm2300_vm14, %v2102_v42, %v685_v24  ;;  %v738_v50 = vmul.f32 %v679_v23, %v1661_v37  ;;  %v2323_v13 = vpop.eup %1291 }
 0x15d   :  { %vm516_vm2 = vweird.f32 %v2098_v57  ;;  %v524_v56 = vsub.f32 1.5, %v523_v17  ;;  %v623_v5 = vmul.f32 0.5, %v622_v47  ;;  %v613_v62 = vmul.f32 0.5, %v612_v15  ;;  %v2327_v58 = vpop.eup %1293  ;;  %vm2373_vm14 = vmor %vm446_vm1, %vm447_vm13 }
 0x15e   :  { %v739_v18 = vmul.f32 %v689_v22, %v1658_v7  ;;  %vm526_vm3 = vweird.f32 %v2186_v51  ;;  %vm527_vm4 = vweird.f32 %v2237_v21  ;;  %v691_v42 = vmul.f32 %v2323_v13, %v2256_v44  ;;  %vm2389_vm11 = vmor %vm516_vm2, %vm517_vm15 }
 0x15f   :  { %v802_v37 = vadd.f32 %v1881_v39, %v766_v34  ;;  %v803_v40 = vadd.f32 %v1881_v39, %v767_v6  ;;  %vm627_vm5 = vweird.f32 %v2266_v32  ;;  %vm616_vm6 = vweird.f32 %v2205_v35  ;;  %v2341_v60 = vpop.eup %1295  ;;  %vm2404_vm15 = vmor %vm526_vm3, %vm527_vm4 }
 0x160   :  { %vm617_vm7 = vweird.f32 %v2272_v45  ;;  %v451_v7 = vmul.f32 %v2327_v58, %v2259_v52  ;;  %v774_v54 = vmul.f32 %v1847_v14, %v738_v50  ;;  %v614_v61 = vsub.f32 1.5, %v613_v62 }
 0x161   :  { %v692_v33 = vmul.f32 %v2323_v13, %v691_v42  ;;  %v824_v1 = vpack.c.bf16 %v803_v40, %v802_v37  ;;  %v775_v63 = vmul.f32 %v1847_v14, %v739_v18  ;;  %v525_v4 = vmul.f32 %v2237_v21, %v524_v56  ;;  %vm2414_vm1 = vmor %vm616_vm6, %vm617_vm7  ;;  %v2603_v37 = vld [vmem:[#allocation12_spill] sm:$0xff] }
 0x162   :  { %v624_v59 = vsub.f32 1.5, %v623_v5  ;;  %vm626_vm8 = vweird.f32 %v2203_v3  ;;  %v452_v53 = vmul.f32 %v2327_v58, %v451_v7  ;;  %v701_v9 = vmul.f32 %v2341_v60, %v2261_v27 }
 0x163   :  { %v693_v8 = vmul.f32 0.5, %v692_v33  ;;  %952 = vmatmul.bf16.gmra.mxu2 %v824_v1  ;;  %v810_v24 = vadd.f32 %v1881_v39, %v774_v54  ;;  %v811_v31 = vadd.f32 %v1881_v39, %v775_v63  ;;  %v333_v43 = vmul.f32 %v277_v19, %v1547_v38  ;;  %vm2438_vm3 = vmor %vm626_vm8, %vm627_vm5 }
 0x164   :  { %vm696_vm9 = vweird.f32 %v2256_v44  ;;  %v453_v17 = vmul.f32 0.5, %v452_v53  ;;  %v702_v2 = vmul.f32 %v2341_v60, %v701_v9  ;;  %v341_v55 = vmul.f32 %v293_v48, %v1547_v38  ;;  %v2609_v48 = vld [vmem:[#allocation14_spill] sm:$0xff] }
 0x165   :  { %v340_v0 = vmul.f32 %v291_v20, %v1547_v38  ;;  %v615_v36 = vmul.f32 %v2272_v45, %v614_v61  ;;  %v694_v12 = vsub.f32 1.5, %v693_v8  ;;  %vm706_vm12 = vweird.f32 %v2261_v27  ;;  %v2613_v38 = vld [vmem:[#allocation16_spill] sm:$0xff] }
 0x166   :  { %v828_v15 = vpack.c.bf16 %v811_v31, %v810_v24  ;;  %v2367_v34 = vadd.f32 1e-06, %v333_v43  ;;  %v703_v26 = vmul.f32 0.5, %v702_v2  ;;  %v2377_v23 = vadd.f32 1e-06, %v341_v55 }
 0x167   :  { %v2379_v6 = vadd.f32 1e-06, %v340_v0  ;;  %v439_v22 = vsel %vm2361_vm10, %v2163_v16, %v2306_v41  ;;  %v625_v50 = vmul.f32 %v2266_v32, %v624_v59  ;;  %vm697_vm13 = vweird.f32 %v2323_v13  ;;  %v2610_v0 = vld [vmem:[#allocation15_spill] sm:$0xff] }
 0x168   :  { %972 = vmatmul.bf16.gmra.mxu3 %v828_v15  ;;  %1297 = vrsqrt.f32 %v2367_v34  ;;  %v449_v16 = vsel %vm2373_vm14, %v2167_v25, %v2315_v29  ;;  %v454_v41 = vsub.f32 1.5, %v453_v17  ;;  %v704_v56 = vsub.f32 1.5, %v703_v26  ;;  %vm2456_vm5 = vmor %vm696_vm9, %vm697_vm13 }
 0x169   :  { %vm707_vm0 = vweird.f32 %v2341_v60  ;;  %1299 = vrsqrt.f32 %v2377_v23  ;;  %v695_v51 = vmul.f32 %v2323_v13, %v694_v12  ;;  %vm456_vm2 = vweird.f32 %v2259_v52 }
 0x16a   :  { %1301 = vrsqrt.f32 %v2379_v6  ;;  %v714_v29 = vmul.f32 %v439_v22, %v1671_v46  ;;  %v715_v5 = vmul.f32 %v449_v16, %v1679_v49  ;;  %v705_v62 = vmul.f32 %v2341_v60, %v704_v56  ;;  %vm2468_vm6 = vmor %vm706_vm12, %vm707_vm0 }
 0x16b   :  { %v519_v35 = vsel %vm2389_vm11, %v2152_v28, %v2290_v11  ;;  %v529_v18 = vsel %vm2404_vm15, %v2237_v21, %v525_v4  ;;  %v619_v42 = vsel %vm2414_vm1, %v2272_v45, %v615_v36  ;;  %v455_v40 = vmul.f32 %v2327_v58, %v454_v41  ;;  %v2604_v45 = vld [vmem:[#allocation13_spill] sm:$0xff] }
 0x16c   :  { %v750_v49 = vmul.f32 %v1847_v14, %v714_v29  ;;  %v751_v28 = vmul.f32 %v1847_v14, %v715_v5  ;;  %v722_v11 = vmul.f32 %v519_v35, %v1676_v10  ;;  %v723_v21 = vmul.f32 %v529_v18, %v2603_v37  ;;  %v2614_v29 = vld [vmem:[#allocation17_spill] sm:$0xff] }
 0x16d   :  { %vm457_vm4 = vweird.f32 %v2327_v58  ;;  %v629_v3 = vsel %vm2438_vm3, %v2266_v32, %v625_v50  ;;  %v732_v7 = vmul.f32 %v619_v42, %v2604_v45  ;;  %vm466_vm7 = vweird.f32 %v2367_v34  ;;  %v2617_v45 = vld [vmem:[#allocation18_spill] sm:$0xff] }
 0x16e   :  { %v1298_v54 = vpop.eup %1297  ;;  %v786_v10 = vadd.f32 %v1881_v39, %v750_v49  ;;  %v787_v61 = vadd.f32 %v1881_v39, %v751_v28  ;;  %v758_v33 = vmul.f32 %v1847_v14, %v722_v11  ;;  %v759_v1 = vmul.f32 %v1847_v14, %v723_v21  ;;  %vm2493_vm9 = vmor %vm456_vm2, %vm457_vm4  ;;  %v2615_v28 = vld [vmem:[#allocation19_spill] sm:$0xff] }
 0x16f   :  { %v1300_v32 = vpop.eup %1299  ;;  %v461_v44 = vmul.f32 %v1298_v54, %v2367_v34  ;;  %v733_v20 = vmul.f32 %v629_v3, %v2609_v48  ;;  %v768_v4 = vmul.f32 %v1847_v14, %v732_v7  ;;  %v699_v59 = vsel %vm2456_vm5, %v2323_v13, %v695_v51 }
 0x170   :  { %v1302_v53 = vpop.eup %1301  ;;  %vm467_vm8 = vweird.f32 %v1298_v54  ;;  %v541_v27 = vmul.f32 %v1300_v32, %v2377_v23  ;;  %v816_v9 = vpack.c.bf16 %v787_v61, %v786_v10  ;;  %v709_v8 = vsel %vm2468_vm6, %v2341_v60, %v705_v62 }
 0x171   :  { %v462_v24 = vmul.f32 %v1298_v54, %v461_v44  ;;  %v531_v31 = vmul.f32 %v1302_v53, %v2379_v6  ;;  %v794_v43 = vadd.f32 %v1881_v39, %v758_v33  ;;  %v795_v17 = vadd.f32 %v1881_v39, %v759_v1  ;;  %vm468_vm14 = vmor %vm466_vm7, %vm467_vm8 }
 0x172   :  { %v542_v2 = vmul.f32 %v1300_v32, %v541_v27  ;;  %912 = vmatmul.bf16.gmra.mxu0 %v816_v9  ;;  %v769_v13 = vmul.f32 %v1847_v14, %v733_v20  ;;  %v804_v55 = vadd.f32 %v1881_v39, %v768_v4  ;;  %v740_v47 = vmul.f32 %v699_v59, %v2610_v0 }
 0x173   :  { %v463_v36 = vmul.f32 0.5, %v462_v24  ;;  %v532_v12 = vmul.f32 %v1302_v53, %v531_v31  ;;  %v820_v15 = vpack.c.bf16 %v795_v17, %v794_v43  ;;  %v741_v26 = vmul.f32 %v709_v8, %v2613_v38 }
 0x174   :  { %v543_v22 = vmul.f32 0.5, %v542_v2  ;;  %v805_v30 = vadd.f32 %v1881_v39, %v769_v13  ;;  %v776_v50 = vmul.f32 %v1847_v14, %v740_v47  ;;  %v459_v16 = vsel %vm2493_vm9, %v2327_v58, %v455_v40  ;;  %v2616_v40 = vld [vmem:[#allocation20_spill] sm:$0xff] }
 0x175   :  { %v464_v57 = vsub.f32 1.5, %v463_v36  ;;  %vm547_vm10 = vweird.f32 %v1300_v32  ;;  %v533_v52 = vmul.f32 0.5, %v532_v12  ;;  %932 = vmatmul.bf16.gmra.mxu1 %v820_v15  ;;  %v777_v41 = vmul.f32 %v1847_v14, %v741_v26 }
 0x176   :  { %v544_v56 = vsub.f32 1.5, %v543_v22  ;;  %v825_v25 = vpack.c.bf16 %v805_v30, %v804_v55  ;;  %v812_v51 = vadd.f32 %v1881_v39, %v776_v50  ;;  %v716_v5 = vmul.f32 %v459_v16, %v2614_v29 }
 0x177   :  { %v465_v62 = vmul.f32 %v1298_v54, %v464_v57  ;;  %v534_v35 = vsub.f32 1.5, %v533_v52  ;;  %vm537_vm12 = vweird.f32 %v1302_v53  ;;  %v813_v18 = vadd.f32 %v1881_v39, %v777_v41 }
 0x178   :  { %v545_v58 = vmul.f32 %v1300_v32, %v544_v56  ;;  %vm546_vm11 = vweird.f32 %v2377_v23  ;;  %957 = vmatmul.bf16.gmra.mxu2 %v825_v25  ;;  %vm536_vm15 = vweird.f32 %v2379_v6  ;;  %v752_v37 = vmul.f32 %v1847_v14, %v716_v5 }
 0x179   :  { %vm548_vm13 = vmor %vm546_vm11, %vm547_vm10  ;;  %v535_v42 = vmul.f32 %v1302_v53, %v534_v35  ;;  %v829_v46 = vpack.c.bf16 %v813_v18, %v812_v51  ;;  %v469_v49 = vsel %vm468_vm14, %v1298_v54, %v465_v62 }
 0x17a   :  { %vm538_vm0 = vmor %vm536_vm15, %vm537_vm12  ;;  %v717_v11 = vmul.f32 %v469_v49, %v2615_v28  ;;  %v549_v21 = vsel %vm548_vm13, %v1300_v32, %v545_v58  ;;  %v788_v6 = vadd.f32 %v1881_v39, %v752_v37 }
 0x17b   :  { %977 = vmatmul.bf16.gmra.mxu3 %v829_v46  ;;  %v539_v34 = vsel %vm538_vm0, %v1302_v53, %v535_v42  ;;  %v725_v3 = vmul.f32 %v549_v21, %v2616_v40 }
 0x17c   :  { %v753_v23 = vmul.f32 %v1847_v14, %v717_v11  ;;  %v724_v7 = vmul.f32 %v539_v34, %v2617_v45 }
 0x17d   :  { %v761_v19 = vmul.f32 %v1847_v14, %v725_v3 }
 0x17e   :  { %v789_v54 = vadd.f32 %v1881_v39, %v753_v23  ;;  %v760_v10 = vmul.f32 %v1847_v14, %v724_v7 }
 0x17f   :  { %v797_v61 = vadd.f32 %v1881_v39, %v761_v19 }
 0x180   :  { %v817_v33 = vpack.c.bf16 %v789_v54, %v788_v6  ;;  %v796_v1 = vadd.f32 %v1881_v39, %v760_v10 }
 0x182   :  { %917 = vmatmul.bf16.gmra.mxu0 %v817_v33  ;;  %v821_v32 = vpack.c.bf16 %v797_v61, %v796_v1 }
 0x185   :  { %937 = vmatmul.bf16.gmra.mxu1 %v821_v32 }
 0x1aa   :  { %v943_v63 = vpop.f32.mrf.mxu2 }
 0x1ae   :  { %v963_v44 = vpop.f32.mrf.mxu3 }
 0x1b2   :  { %v903_v48 = vpop.f32.mrf.mxu0  ;;  %v945_v20 = vpop.f32.mrf.mxu2 }
 0x1b3   :  { %v1150_v4 = vpack.c.bf16 %v945_v20, %v943_v63 }
 0x1b5   :  { %v923_v59 = vpop.f32.mrf.mxu1  ;;  %1194 = vst [vmem:[#allocation8 + $0x40] sm:$0xff] %v1150_v4  }
 0x1b6   :  { %v965_v53 = vpop.f32.mrf.mxu3 }
 0x1b7   :  { %v1170_v27 = vpack.c.bf16 %v965_v53, %v963_v44 }
 0x1b9   :  { %1198 = vst [vmem:[#allocation8 + $0x60] sm:$0xff] %v1170_v27  }
 0x1ba   :  { %v905_v9 = vpop.f32.mrf.mxu0 }
 0x1bb   :  { %v1110_v14 = vpack.c.bf16 %v905_v9, %v903_v48 }
 0x1bd   :  { %1111 = vst [vmem:[#allocation8] sm:$0xff] %v1110_v14   ;;  %v925_v8 = vpop.f32.mrf.mxu1 }
 0x1be   :  { %v1130_v24 = vpack.c.bf16 %v925_v8, %v923_v59 }
 0x1c0   :  { %1190 = vst [vmem:[#allocation8 + $0x20] sm:$0xff] %v1130_v24  }
 0x1c5   :  { %v948_v39 = vpop.f32.mrf.mxu2 }
 0x1c6   :  { %v908_v31 = vpop.f32.mrf.mxu0 }
 0x1cd   :  { %v950_v43 = vpop.f32.mrf.mxu2 }
 0x1ce   :  { %v1155_v17 = vpack.c.bf16 %v950_v43, %v948_v39  ;;  %v910_v2 = vpop.f32.mrf.mxu0 }
 0x1cf   :  { %v1115_v13 = vpack.c.bf16 %v910_v2, %v908_v31 }
 0x1d0   :  { %1195 = vst [vmem:[#allocation8 + $0x48] sm:$0xff] %v1155_v17  }
 0x1d1   :  { %1187 = vst [vmem:[#allocation8 + $0x8] sm:$0xff] %v1115_v13  }
 0x1d4   :  { %v968_v55 = vpop.f32.mrf.mxu3 }
 0x1d7   :  { %v928_v0 = vpop.f32.mrf.mxu1 }
 0x1dc   :  { %v970_v47 = vpop.f32.mrf.mxu3 }
 0x1dd   :  { %v1175_v60 = vpack.c.bf16 %v970_v47, %v968_v55 }
 0x1df   :  { %1199 = vst [vmem:[#allocation8 + $0x68] sm:$0xff] %v1175_v60   ;;  %v930_v36 = vpop.f32.mrf.mxu1 }
 0x1e0   :  { %v1135_v12 = vpack.c.bf16 %v930_v36, %v928_v0 }
 0x1e2   :  { %1191 = vst [vmem:[#allocation8 + $0x28] sm:$0xff] %v1135_v12  }
 0x1e6   :  { %v953_v15 = vpop.f32.mrf.mxu2 }
 0x1eb   :  { %v973_v38 = vpop.f32.mrf.mxu3 }
 0x1ee   :  { %v955_v22 = vpop.f32.mrf.mxu2 }
 0x1ef   :  { %v913_v26 = vpop.f32.mrf.mxu0  ;;  %v1160_v30 = vpack.c.bf16 %v955_v22, %v953_v15 }
 0x1f1   :  { %1196 = vst [vmem:[#allocation8 + $0x50] sm:$0xff] %v1160_v30  }
 0x1f2   :  { %v933_v50 = vpop.f32.mrf.mxu1 }
 0x1f3   :  { %v975_v16 = vpop.f32.mrf.mxu3 }
 0x1f4   :  { %v1180_v57 = vpack.c.bf16 %v975_v16, %v973_v38 }
 0x1f6   :  { %1200 = vst [vmem:[#allocation8 + $0x70] sm:$0xff] %v1180_v57  }
 0x1f7   :  { %v915_v52 = vpop.f32.mrf.mxu0 }
 0x1f8   :  { %v1120_v41 = vpack.c.bf16 %v915_v52, %v913_v26 }
 0x1fa   :  { %1188 = vst [vmem:[#allocation8 + $0x10] sm:$0xff] %v1120_v41   ;;  %v935_v56 = vpop.f32.mrf.mxu1 }
 0x1fb   :  { %v958_v25 = vpop.f32.mrf.mxu2  ;;  %v1140_v51 = vpack.c.bf16 %v935_v56, %v933_v50 }
 0x1fd   :  { %1192 = vst [vmem:[#allocation8 + $0x30] sm:$0xff] %v1140_v51  }
 0x1fe   :  { %v978_v29 = vpop.f32.mrf.mxu3 }
 0x1ff   :  { %v918_v5 = vpop.f32.mrf.mxu0 }
 0x202   :  { %v938_v62 = vpop.f32.mrf.mxu1 }
 0x203   :  { %v960_v35 = vpop.f32.mrf.mxu2 }
 0x204   :  { %v1165_v18 = vpack.c.bf16 %v960_v35, %v958_v25 }
 0x206   :  { %1197 = vst [vmem:[#allocation8 + $0x58] sm:$0xff] %v1165_v18   ;;  %v980_v58 = vpop.f32.mrf.mxu3 }
 0x207   :  { %v1185_v42 = vpack.c.bf16 %v980_v58, %v978_v29  ;;  %v920_v46 = vpop.f32.mrf.mxu0 }
 0x208   :  { %v1125_v49 = vpack.c.bf16 %v920_v46, %v918_v5 }
 0x209   :  { %1201 = vst [vmem:[#allocation8 + $0x78] sm:$0xff] %v1185_v42  }
 0x20a   :  { %1189 = vst [vmem:[#allocation8 + $0x18] sm:$0xff] %v1125_v49   ;;  %v940_v28 = vpop.f32.mrf.mxu1 }
 0x20b   :  { %v1145_v11 = vpack.c.bf16 %v940_v28, %v938_v62 }
 0x20d   :  { %1193 = vst [vmem:[#allocation8 + $0x38] sm:$0xff] %v1145_v11  }
 0x20e   :  { %1059 = dma.vmem_to_hbm [thread:$0]  %s1052_s7, 2048, %s1054_s10, [#allocation4], %s1410_s5, %s1410_s5, %s1411_s6  }
 0x20f   :  { %1403 = dma.done.wait [#allocation4], 2048  }
 0x210   :  { %1404 = vsyncadd [#allocation4], 4294965248 }
 0x211   :  { %1064 = vsyncpa [#allocation3], 1 }
 0x212   :  { %1065 = vsyncpa [#allocation6], 1 }
 0x213   :  { %1066 = vsyncpa [#allocation4], 1 }

</bundles_post_ra>
